<compile_context>
chip_gen: v7x
topology: tpu7x:2x2x1
jax: 0.10.0
libtpu: 0.0.40
codegen_flags: <defaults>
</compile_context>

<pallas_src>
import functools

import jax
import jax.numpy as jnp
from jax.experimental import pallas as pl
from jax.experimental.pallas import tpu as pltpu


# ----------------------------------------------------------------------------
# Fused kernel: MaxUnpool2d(2,2) + 3 x (conv3x3 pad=1 + folded BN + ReLU)
# ----------------------------------------------------------------------------
def _segnet_up3_kernel(p_ref, idx_ref, tgt_ref, rsel_ref, csel_ref, mask_ref,
                       g1_ref, s1_ref, b1_ref,
                       g2_ref, s2_ref, b2_ref,
                       g3_ref, s3_ref, b3_ref,
                       o_ref, pad_ref, *, cin, cout):
    # p_ref:    (NB, Ho, Wo*cin)   pooled activations (lane-flattened NHWC), f32
    # idx_ref:  (NB, Ho, Wo*cin)   int32 flat indices into H*W (torch MaxPool2d)
    # tgt_ref:  (Ho, Wo*cin)       int32 base flat target index (2*ho*W + 2*wo)
    # rsel_ref: (2, H, Ho)         bf16 0/1 row-upsample selectors (r = 0, 1)
    # csel_ref: (2, Wo*cin, W*cin) bf16 0/1 col-upsample selectors (s = 0, 1)
    # mask_ref: (Rm, 1)            f32 interior-row mask for the stacked padded layout
    # gK_ref:   (3, W*cin, W*co)   block-banded 3x3 weights (dw + col-pad folded in), bf16
    # sK/bK:    (1, W*co)          folded BN scale / bias, tiled per lane, f32
    # o_ref:    (NB, H, W*cout)    final activation (lane-dense), f32
    # pad_ref:  (NB*(H+2), W*cin)  bf16 VMEM padded activation, reused across all layers
    NB, Ho = p_ref.shape[0], p_ref.shape[1]
    Wo = p_ref.shape[2] // cin
    H, W = 2 * Ho, 2 * Wo
    WC = W * cin
    S = H + 2                       # per-image row stride (zero halo row above and below)
    Rm = NB * S - 2                 # conv-output rows (pad rows 1 .. NB*S-2)

    # ---- re-zero only the halo rows every step (interior rows are always rewritten) ----
    zrow = jnp.zeros((1, WC), jnp.bfloat16)
    for b in range(NB):
        pad_ref[b * S:b * S + 1, :] = zrow
        pad_ref[b * S + H + 1:b * S + H + 2, :] = zrow

    # ---- MaxUnpool2d(2, 2): scatter-free, selectors precomputed on the host -----------
    for b in range(NB):
        p_b = p_ref[b]                                   # (Ho, Wo*cin) f32
        i_b = idx_ref[b]                                 # (Ho, Wo*cin) int32
        unp = jnp.zeros((H, WC), jnp.float32)
        for r in (0, 1):
            e_r = jnp.zeros((Ho, WC), jnp.float32)
            for s in (0, 1):
                cand = jnp.where(i_b == tgt_ref[...] + (r * W + s), p_b, 0.0)
                e_r = e_r + jnp.dot(cand.astype(jnp.bfloat16), csel_ref[s],
                                    preferred_element_type=jnp.float32)
            unp = unp + jnp.dot(rsel_ref[r], e_r.astype(jnp.bfloat16),
                                preferred_element_type=jnp.float32)
        pad_ref[b * S + 1:b * S + 1 + H, :] = unp.astype(jnp.bfloat16)

    # ---- conv3x3 (pad=1) + folded BN + ReLU: 3 banded MXU matmuls per layer ------------
    def conv3x3(g_ref, s_ref, b_ref, co):
        acc = jnp.zeros((Rm, W * co), jnp.float32)
        for dh in range(3):                              # dh-offset sublane slices only
            acc = acc + jnp.dot(pad_ref[dh:dh + Rm, :], g_ref[dh],
                                preferred_element_type=jnp.float32)
        return jnp.maximum(acc * s_ref[...] + b_ref[...], 0.0)      # f32 epilogue

    y1 = conv3x3(g1_ref, s1_ref, b1_ref, cin) * mask_ref[...]       # keep halos zero
    pad_ref[1:1 + Rm, :] = y1.astype(jnp.bfloat16)
    y2 = conv3x3(g2_ref, s2_ref, b2_ref, cin) * mask_ref[...]
    pad_ref[1:1 + Rm, :] = y2.astype(jnp.bfloat16)
    y3 = conv3x3(g3_ref, s3_ref, b3_ref, cout)                      # (Rm, W*cout)
    for b in range(NB):
        o_ref[b] = y3[b * S:b * S + H].astype(o_ref.dtype)


# ----------------------------------------------------------------------------
# Host-side parameter / constant packing for the lane-flattened layout
# ----------------------------------------------------------------------------
def _expand_layer(params, W):
    """Block-banded weights (dw + column padding folded in) + lane-tiled BN affine."""
    w = params["w"]                                      # (3, 3, ci, co)
    ci, co = w.shape[2], w.shape[3]
    wi = jnp.arange(W)[:, None]
    wo = jnp.arange(W)[None, :]
    dw = wi - wo + 1                                     # input col wi -> output col wo tap
    valid = (dw >= 0) & (dw <= 2)
    taps = w[:, jnp.clip(dw, 0, 2)]                      # (3, W, W, ci, co)
    taps = jnp.where(valid[None, :, :, None, None], taps, 0.0)
    g = taps.transpose(0, 1, 3, 2, 4).reshape(3, W * ci, W * co)
    scale = jnp.tile(params["scale"], W).reshape(1, W * co).astype(jnp.float32)
    bias = jnp.tile(params["bias"], W).reshape(1, W * co).astype(jnp.float32)
    return g.astype(jnp.bfloat16), scale, bias


def _unpool_constants(Ho, Wo, cin, NB):
    """Grid-invariant unpool selectors / target map / interior-row mask (host-built)."""
    H, W = 2 * Ho, 2 * Wo
    S, Rm = H + 2, NB * (H + 2) - 2
    base = (2 * jnp.arange(Ho)[:, None]) * W + 2 * jnp.arange(Wo)[None, :]
    base_tgt = jnp.repeat(base, cin, axis=1).astype(jnp.int32)        # (Ho, Wo*cin)
    h = jnp.arange(H)[:, None]
    rsel = jnp.stack([h == 2 * jnp.arange(Ho)[None, :] + r for r in (0, 1)]
                     ).astype(jnp.bfloat16)                           # (2, H, Ho)
    qi = jnp.arange(Wo * cin)[:, None]
    qj = jnp.arange(W * cin)[None, :]
    same_c = (qj % cin) == (qi % cin)
    csel = jnp.stack([((qj // cin) == 2 * (qi // cin) + s) & same_c for s in (0, 1)]
                     ).astype(jnp.bfloat16)                           # (2, Wo*cin, W*cin)
    pr = jnp.arange(Rm) + 1
    mask = jnp.logical_not(((pr % S) == 0) | ((pr % S) == H + 1)
                           ).astype(jnp.float32)[:, None]             # (Rm, 1)
    return base_tgt, rsel, csel, mask


def _pick_batch_tile(N, H, target_rows=128):
    """Largest divisor of N whose stacked padded height stays near target_rows."""
    cap = max(1, target_rows // (H + 2))
    nb = 1
    for d in range(1, min(N, cap) + 1):
        if N % d == 0:
            nb = d
    return nb


def segnet_up3_forward(inputs_nchw, indices_nchw, output_shape, params):
    """SegnetUp3.forward: unpool(inputs, indices, output_shape) -> conv1 -> conv2 -> conv3."""
    N, Cin, Ho, Wo = inputs_nchw.shape
    H, W = int(output_shape[2]), int(output_shape[3])
    assert H == 2 * Ho and W == 2 * Wo, "MaxUnpool2d(2,2) output size mismatch"
    Cout = params[2]["w"].shape[-1]

    NB = _pick_batch_tile(N, H)                          # images batched along matmul M
    Rm = NB * (H + 2) - 2

    # NCHW -> NHWC -> merge (W, C) onto the lane dim.  In a full NHWC SegNet pipeline
    # these transposes disappear; kept only to match the PyTorch NCHW interface.
    x2d = jnp.transpose(inputs_nchw, (0, 2, 3, 1)).reshape(N, Ho, Wo * Cin)
    i2d = jnp.transpose(indices_nchw.astype(jnp.int32), (0, 2, 3, 1)).reshape(N, Ho, Wo * Cin)

    base_tgt, rsel, csel, mask = _unpool_constants(Ho, Wo, Cin, NB)
    g1, s1, b1 = _expand_layer(params[0], W)
    g2, s2, b2 = _expand_layer(params[1], W)
    g3, s3, b3 = _expand_layer(params[2], W)

    const2 = lambda n: (0, 0)
    const3 = lambda n: (0, 0, 0)
    kernel = functools.partial(_segnet_up3_kernel, cin=Cin, cout=Cout)
    out2d = pl.pallas_call(
        kernel,
        out_shape=jax.ShapeDtypeStruct((N, H, W * Cout), jnp.float32),
        grid=(N // NB,),
        in_specs=[
            pl.BlockSpec((NB, Ho, Wo * Cin), lambda n: (n, 0, 0)),
            pl.BlockSpec((NB, Ho, Wo * Cin), lambda n: (n, 0, 0)),
            pl.BlockSpec((Ho, Wo * Cin), const2),
            pl.BlockSpec((2, H, Ho), const3),
            pl.BlockSpec((2, Wo * Cin, W * Cin), const3),
            pl.BlockSpec((Rm, 1), const2),
            pl.BlockSpec((3, W * Cin, W * Cin), const3),
            pl.BlockSpec((1, W * Cin), const2),
            pl.BlockSpec((1, W * Cin), const2),
            pl.BlockSpec((3, W * Cin, W * Cin), const3),
            pl.BlockSpec((1, W * Cin), const2),
            pl.BlockSpec((1, W * Cin), const2),
            pl.BlockSpec((3, W * Cin, W * Cout), const3),
            pl.BlockSpec((1, W * Cout), const2),
            pl.BlockSpec((1, W * Cout), const2),
        ],
        out_specs=pl.BlockSpec((NB, H, W * Cout), lambda n: (n, 0, 0)),
        scratch_shapes=[pltpu.VMEM((NB * (H + 2), W * Cin), jnp.bfloat16)],
        compiler_params=pltpu.CompilerParams(
            dimension_semantics=("parallel",),     # lets v7x split remaining grid steps
            vmem_limit_bytes=32 * 1024 * 1024),
    )(x2d, i2d, base_tgt, rsel, csel, mask, g1, s1, b1, g2, s2, b2, g3, s3, b3)

    out = out2d.reshape(N, H, W, Cout)             # free split of the lane dim
    return jnp.transpose(out, (0, 3, 1, 2))        # back to NCHW (PyTorch convention)


# ----------------------------------------------------------------------------
# Parameters (deterministic synthetic init)
# ----------------------------------------------------------------------------
def init_layer_params(key, cin, cout):
    kw, kb, kg, kbe, km, kv = jax.random.split(key, 6)
    w = 0.1 * jax.random.normal(kw, (3, 3, cin, cout), jnp.float32)
    conv_b = 0.1 * jax.random.normal(kb, (cout,), jnp.float32)
    gamma = 1.0 + 0.1 * jax.random.normal(kg, (cout,), jnp.float32)
    beta = 0.1 * jax.random.normal(kbe, (cout,), jnp.float32)
    run_mean = 0.1 * jax.random.normal(km, (cout,), jnp.float32)
    run_var = 1.0 + 0.1 * jax.random.uniform(kv, (cout,), jnp.float32)
    eps = 1e-5
    scale = gamma / jnp.sqrt(run_var + eps)        # fold eval-mode BN into an affine
    bias = (conv_b - run_mean) * scale + beta
    return {"w": w, "scale": scale, "bias": bias}


def init_segnet_up3_params(key, in_size, out_size):
    k1, k2, k3 = jax.random.split(key, 3)
    return [
        init_layer_params(k1, in_size, in_size),   # conv1: in_size -> in_size
        init_layer_params(k2, in_size, in_size),   # conv2: in_size -> in_size
        init_layer_params(k3, in_size, out_size),  # conv3: in_size -> out_size
    ]


if __name__ == "__main__":
    key = jax.random.PRNGKey(0)
    kx, kp = jax.random.split(key)

    N, in_size, out_size = 2, 4, 8
    H, W = 16, 16
    Ho, Wo = H // 2, W // 2

    # Build (inputs, indices) the way SegNet does: 2x2 max-pool with flat argmax over a
    # random feature map, so the indices are valid torch.nn.MaxPool2d indices.
    x_full = jax.random.normal(kx, (N, in_size, H, W), jnp.float32)
    xw = jnp.transpose(x_full.reshape(N, in_size, Ho, 2, Wo, 2), (0, 1, 2, 4, 3, 5))
    xw = xw.reshape(N, in_size, Ho, Wo, 4)         # window candidates, k = r*2 + s
    k = jnp.argmax(xw, axis=-1)
    pooled = jnp.max(xw, axis=-1)                  # (N, C, Ho, Wo)
    r, s = k // 2, k % 2
    ho_i = jnp.arange(Ho).reshape(1, 1, Ho, 1)
    wo_i = jnp.arange(Wo).reshape(1, 1, 1, Wo)
    indices = ((2 * ho_i + r) * W + (2 * wo_i + s)).astype(jnp.int32)

    params = init_segnet_up3_params(kp, in_size, out_size)
    out = segnet_up3_forward(pooled, indices, (N, in_size, H, W), params)
    jax.block_until_ready(out)

    assert out.shape == (N, out_size, H, W)
    assert out.dtype == jnp.float32
    assert bool(jnp.all(jnp.isfinite(out)))
    print("KERNEL_OK")
</pallas_src>

<mosaic_0001>
module attributes {stable_mosaic.version = 11 : i64} {
  func.func @_segnet_up3_kernel(%arg0: i32, %arg1: memref<2x8x32xf32, #tpu.memory_space<vmem>>, %arg2: memref<2x8x32xi32, #tpu.memory_space<vmem>>, %arg3: memref<8x32xi32, #tpu.memory_space<vmem>>, %arg4: memref<2x16x8xbf16, #tpu.memory_space<vmem>>, %arg5: memref<2x32x64xbf16, #tpu.memory_space<vmem>>, %arg6: memref<34x1xf32, #tpu.memory_space<vmem>>, %arg7: memref<3x64x64xbf16, #tpu.memory_space<vmem>>, %arg8: memref<1x64xf32, #tpu.memory_space<vmem>>, %arg9: memref<1x64xf32, #tpu.memory_space<vmem>>, %arg10: memref<3x64x64xbf16, #tpu.memory_space<vmem>>, %arg11: memref<1x64xf32, #tpu.memory_space<vmem>>, %arg12: memref<1x64xf32, #tpu.memory_space<vmem>>, %arg13: memref<3x64x128xbf16, #tpu.memory_space<vmem>>, %arg14: memref<1x128xf32, #tpu.memory_space<vmem>>, %arg15: memref<1x128xf32, #tpu.memory_space<vmem>>, %arg16: memref<2x16x128xf32, #tpu.memory_space<vmem>>, %arg17: memref<36x64xbf16, #tpu.memory_space<vmem>>) attributes {dimension_semantics = [#tpu.dimension_semantics<parallel>], iteration_bounds = array<i64: 1>, scalar_prefetch = 0 : i64, scratch_operands = 1 : i64, tpu.core_type = #tpu.core_type<tc>, window_params = [{transform_indices = @transform_0, window_bounds = array<i64: 2, 8, 32>}, {transform_indices = @transform_1, window_bounds = array<i64: 2, 8, 32>}, {pipeline_mode = #tpu.pipeline_mode<synchronous>, transform_indices = @transform_2, window_bounds = array<i64: 8, 32>}, {pipeline_mode = #tpu.pipeline_mode<synchronous>, transform_indices = @transform_3, window_bounds = array<i64: 2, 16, 8>}, {pipeline_mode = #tpu.pipeline_mode<synchronous>, transform_indices = @transform_4, window_bounds = array<i64: 2, 32, 64>}, {pipeline_mode = #tpu.pipeline_mode<synchronous>, transform_indices = @transform_5, window_bounds = array<i64: 34, 1>}, {pipeline_mode = #tpu.pipeline_mode<synchronous>, transform_indices = @transform_6, window_bounds = array<i64: 3, 64, 64>}, {pipeline_mode = #tpu.pipeline_mode<synchronous>, transform_indices = @transform_7, window_bounds = array<i64: 1, 64>}, {pipeline_mode = #tpu.pipeline_mode<synchronous>, transform_indices = @transform_8, window_bounds = array<i64: 1, 64>}, {pipeline_mode = #tpu.pipeline_mode<synchronous>, transform_indices = @transform_9, window_bounds = array<i64: 3, 64, 64>}, {pipeline_mode = #tpu.pipeline_mode<synchronous>, transform_indices = @transform_10, window_bounds = array<i64: 1, 64>}, {pipeline_mode = #tpu.pipeline_mode<synchronous>, transform_indices = @transform_11, window_bounds = array<i64: 1, 64>}, {pipeline_mode = #tpu.pipeline_mode<synchronous>, transform_indices = @transform_12, window_bounds = array<i64: 3, 64, 128>}, {pipeline_mode = #tpu.pipeline_mode<synchronous>, transform_indices = @transform_13, window_bounds = array<i64: 1, 128>}, {pipeline_mode = #tpu.pipeline_mode<synchronous>, transform_indices = @transform_14, window_bounds = array<i64: 1, 128>}, {transform_indices = @transform_15, window_bounds = array<i64: 2, 16, 128>}]} {
    %cst = arith.constant 0.000000e+00 : bf16
    %0 = vector.broadcast %cst : bf16 to vector<1x64xbf16>
    %c0 = arith.constant 0 : index
    %c0_0 = arith.constant 0 : index
    %1 = vector.load %arg17[%c0, %c0_0] : memref<36x64xbf16, #tpu.memory_space<vmem>>, vector<1x64xbf16>
    tpu.vector_store %arg17[%c0, %c0_0], %0 {strides = array<i32>} : memref<36x64xbf16, #tpu.memory_space<vmem>>, vector<1x64xbf16>,
    %c17 = arith.constant 17 : index
    %c0_1 = arith.constant 0 : index
    %2 = vector.load %arg17[%c17, %c0_1] : memref<36x64xbf16, #tpu.memory_space<vmem>>, vector<1x64xbf16>
    tpu.vector_store %arg17[%c17, %c0_1], %0 {strides = array<i32>} : memref<36x64xbf16, #tpu.memory_space<vmem>>, vector<1x64xbf16>,
    %c18 = arith.constant 18 : index
    %c0_2 = arith.constant 0 : index
    %3 = vector.load %arg17[%c18, %c0_2] : memref<36x64xbf16, #tpu.memory_space<vmem>>, vector<1x64xbf16>
    tpu.vector_store %arg17[%c18, %c0_2], %0 {strides = array<i32>} : memref<36x64xbf16, #tpu.memory_space<vmem>>, vector<1x64xbf16>,
    %c35 = arith.constant 35 : index
    %c0_3 = arith.constant 0 : index
    %4 = vector.load %arg17[%c35, %c0_3] : memref<36x64xbf16, #tpu.memory_space<vmem>>, vector<1x64xbf16>
    tpu.vector_store %arg17[%c35, %c0_3], %0 {strides = array<i32>} : memref<36x64xbf16, #tpu.memory_space<vmem>>, vector<1x64xbf16>,
    %c0_4 = arith.constant 0 : index
    %c0_5 = arith.constant 0 : index
    %c0_6 = arith.constant 0 : index
    %5 = vector.load %arg1[%c0_4, %c0_5, %c0_6] : memref<2x8x32xf32, #tpu.memory_space<vmem>>, vector<1x8x32xf32>
    %6 = vector.shape_cast %5 : vector<1x8x32xf32> to vector<8x32xf32>
    %c0_7 = arith.constant 0 : index
    %c0_8 = arith.constant 0 : index
    %c0_9 = arith.constant 0 : index
    %7 = vector.load %arg2[%c0_7, %c0_8, %c0_9] : memref<2x8x32xi32, #tpu.memory_space<vmem>>, vector<1x8x32xi32>
    %8 = vector.shape_cast %7 : vector<1x8x32xi32> to vector<8x32xi32>
    %cst_10 = arith.constant 0.000000e+00 : f32
    %9 = vector.broadcast %cst_10 : f32 to vector<16x64xf32>
    %cst_11 = arith.constant 0.000000e+00 : f32
    %10 = vector.broadcast %cst_11 : f32 to vector<8x64xf32>
    %c0_12 = arith.constant 0 : index
    %c0_13 = arith.constant 0 : index
    %11 = vector.load %arg3[%c0_12, %c0_13] : memref<8x32xi32, #tpu.memory_space<vmem>>, vector<8x32xi32>
    %c0_i32 = arith.constant 0 : i32
    %12 = vector.broadcast %c0_i32 : i32 to vector<8x32xi32>
    %13 = arith.addi %11, %12 : vector<8x32xi32>
    %14 = arith.cmpi eq, %8, %13 : vector<8x32xi32>
    %cst_14 = arith.constant 0.000000e+00 : f32
    %15 = vector.broadcast %cst_14 : f32 to vector<8x32xf32>
    %16 = arith.select %14, %6, %15 : vector<8x32xi1>, vector<8x32xf32>
    %17 = arith.truncf %16 : vector<8x32xf32> to vector<8x32xbf16>
    %c0_15 = arith.constant 0 : index
    %c0_16 = arith.constant 0 : index
    %c0_17 = arith.constant 0 : index
    %18 = vector.load %arg5[%c0_15, %c0_16, %c0_17] : memref<2x32x64xbf16, #tpu.memory_space<vmem>>, vector<1x32x64xbf16>
    %19 = vector.shape_cast %18 : vector<1x32x64xbf16> to vector<32x64xbf16>
    %cst_18 = arith.constant dense<0.000000e+00> : vector<8x64xf32>
    %20 = tpu.matmul %17, %19, %cst_18 {dimension_numbers = #tpu.dot_dimension_numbers<[1], [0], [0], [1], [0, 0, 1, 1], [], []>} : vector<8x32xbf16>, vector<32x64xbf16>, vector<8x64xf32> -> vector<8x64xf32>
    %21 = arith.addf %10, %20 : vector<8x64xf32>
    %c0_19 = arith.constant 0 : index
    %c0_20 = arith.constant 0 : index
    %22 = vector.load %arg3[%c0_19, %c0_20] : memref<8x32xi32, #tpu.memory_space<vmem>>, vector<8x32xi32>
    %c1_i32 = arith.constant 1 : i32
    %23 = vector.broadcast %c1_i32 : i32 to vector<8x32xi32>
    %24 = arith.addi %22, %23 : vector<8x32xi32>
    %25 = arith.cmpi eq, %8, %24 : vector<8x32xi32>
    %cst_21 = arith.constant 0.000000e+00 : f32
    %26 = vector.broadcast %cst_21 : f32 to vector<8x32xf32>
    %27 = arith.select %25, %6, %26 : vector<8x32xi1>, vector<8x32xf32>
    %28 = arith.truncf %27 : vector<8x32xf32> to vector<8x32xbf16>
    %c1 = arith.constant 1 : index
    %c0_22 = arith.constant 0 : index
    %c0_23 = arith.constant 0 : index
    %29 = vector.load %arg5[%c1, %c0_22, %c0_23] : memref<2x32x64xbf16, #tpu.memory_space<vmem>>, vector<1x32x64xbf16>
    %30 = vector.shape_cast %29 : vector<1x32x64xbf16> to vector<32x64xbf16>
    %cst_24 = arith.constant dense<0.000000e+00> : vector<8x64xf32>
    %31 = tpu.matmul %28, %30, %cst_24 {dimension_numbers = #tpu.dot_dimension_numbers<[1], [0], [0], [1], [0, 0, 1, 1], [], []>} : vector<8x32xbf16>, vector<32x64xbf16>, vector<8x64xf32> -> vector<8x64xf32>
    %32 = arith.addf %21, %31 : vector<8x64xf32>
    %c0_25 = arith.constant 0 : index
    %c0_26 = arith.constant 0 : index
    %c0_27 = arith.constant 0 : index
    %33 = vector.load %arg4[%c0_25, %c0_26, %c0_27] : memref<2x16x8xbf16, #tpu.memory_space<vmem>>, vector<1x16x8xbf16>
    %34 = vector.shape_cast %33 : vector<1x16x8xbf16> to vector<16x8xbf16>
    %35 = arith.truncf %32 : vector<8x64xf32> to vector<8x64xbf16>
    %cst_28 = arith.constant dense<0.000000e+00> : vector<16x64xf32>
    %36 = tpu.matmul %34, %35, %cst_28 {dimension_numbers = #tpu.dot_dimension_numbers<[1], [0], [0], [1], [0, 0, 1, 1], [], []>} : vector<16x8xbf16>, vector<8x64xbf16>, vector<16x64xf32> -> vector<16x64xf32>
    %37 = arith.addf %9, %36 : vector<16x64xf32>
    %cst_29 = arith.constant 0.000000e+00 : f32
    %38 = vector.broadcast %cst_29 : f32 to vector<8x64xf32>
    %c0_30 = arith.constant 0 : index
    %c0_31 = arith.constant 0 : index
    %39 = vector.load %arg3[%c0_30, %c0_31] : memref<8x32xi32, #tpu.memory_space<vmem>>, vector<8x32xi32>
    %c16_i32 = arith.constant 16 : i32
    %40 = vector.broadcast %c16_i32 : i32 to vector<8x32xi32>
    %41 = arith.addi %39, %40 : vector<8x32xi32>
    %42 = arith.cmpi eq, %8, %41 : vector<8x32xi32>
    %cst_32 = arith.constant 0.000000e+00 : f32
    %43 = vector.broadcast %cst_32 : f32 to vector<8x32xf32>
    %44 = arith.select %42, %6, %43 : vector<8x32xi1>, vector<8x32xf32>
    %45 = arith.truncf %44 : vector<8x32xf32> to vector<8x32xbf16>
    %c0_33 = arith.constant 0 : index
    %c0_34 = arith.constant 0 : index
    %c0_35 = arith.constant 0 : index
    %46 = vector.load %arg5[%c0_33, %c0_34, %c0_35] : memref<2x32x64xbf16, #tpu.memory_space<vmem>>, vector<1x32x64xbf16>
    %47 = vector.shape_cast %46 : vector<1x32x64xbf16> to vector<32x64xbf16>
    %cst_36 = arith.constant dense<0.000000e+00> : vector<8x64xf32>
    %48 = tpu.matmul %45, %47, %cst_36 {dimension_numbers = #tpu.dot_dimension_numbers<[1], [0], [0], [1], [0, 0, 1, 1], [], []>} : vector<8x32xbf16>, vector<32x64xbf16>, vector<8x64xf32> -> vector<8x64xf32>
    %49 = arith.addf %38, %48 : vector<8x64xf32>
    %c0_37 = arith.constant 0 : index
    %c0_38 = arith.constant 0 : index
    %50 = vector.load %arg3[%c0_37, %c0_38] : memref<8x32xi32, #tpu.memory_space<vmem>>, vector<8x32xi32>
    %c17_i32 = arith.constant 17 : i32
    %51 = vector.broadcast %c17_i32 : i32 to vector<8x32xi32>
    %52 = arith.addi %50, %51 : vector<8x32xi32>
    %53 = arith.cmpi eq, %8, %52 : vector<8x32xi32>
    %cst_39 = arith.constant 0.000000e+00 : f32
    %54 = vector.broadcast %cst_39 : f32 to vector<8x32xf32>
    %55 = arith.select %53, %6, %54 : vector<8x32xi1>, vector<8x32xf32>
    %56 = arith.truncf %55 : vector<8x32xf32> to vector<8x32xbf16>
    %c1_40 = arith.constant 1 : index
    %c0_41 = arith.constant 0 : index
    %c0_42 = arith.constant 0 : index
    %57 = vector.load %arg5[%c1_40, %c0_41, %c0_42] : memref<2x32x64xbf16, #tpu.memory_space<vmem>>, vector<1x32x64xbf16>
    %58 = vector.shape_cast %57 : vector<1x32x64xbf16> to vector<32x64xbf16>
    %cst_43 = arith.constant dense<0.000000e+00> : vector<8x64xf32>
    %59 = tpu.matmul %56, %58, %cst_43 {dimension_numbers = #tpu.dot_dimension_numbers<[1], [0], [0], [1], [0, 0, 1, 1], [], []>} : vector<8x32xbf16>, vector<32x64xbf16>, vector<8x64xf32> -> vector<8x64xf32>
    %60 = arith.addf %49, %59 : vector<8x64xf32>
    %c1_44 = arith.constant 1 : index
    %c0_45 = arith.constant 0 : index
    %c0_46 = arith.constant 0 : index
    %61 = vector.load %arg4[%c1_44, %c0_45, %c0_46] : memref<2x16x8xbf16, #tpu.memory_space<vmem>>, vector<1x16x8xbf16>
    %62 = vector.shape_cast %61 : vector<1x16x8xbf16> to vector<16x8xbf16>
    %63 = arith.truncf %60 : vector<8x64xf32> to vector<8x64xbf16>
    %cst_47 = arith.constant dense<0.000000e+00> : vector<16x64xf32>
    %64 = tpu.matmul %62, %63, %cst_47 {dimension_numbers = #tpu.dot_dimension_numbers<[1], [0], [0], [1], [0, 0, 1, 1], [], []>} : vector<16x8xbf16>, vector<8x64xbf16>, vector<16x64xf32> -> vector<16x64xf32>
    %65 = arith.addf %37, %64 : vector<16x64xf32>
    %66 = arith.truncf %65 : vector<16x64xf32> to vector<16x64xbf16>
    %c1_48 = arith.constant 1 : index
    %c0_49 = arith.constant 0 : index
    %67 = vector.load %arg17[%c1_48, %c0_49] : memref<36x64xbf16, #tpu.memory_space<vmem>>, vector<16x64xbf16>
    tpu.vector_store %arg17[%c1_48, %c0_49], %66 {strides = array<i32>} : memref<36x64xbf16, #tpu.memory_space<vmem>>, vector<16x64xbf16>,
    %c1_50 = arith.constant 1 : index
    %c0_51 = arith.constant 0 : index
    %c0_52 = arith.constant 0 : index
    %68 = vector.load %arg1[%c1_50, %c0_51, %c0_52] : memref<2x8x32xf32, #tpu.memory_space<vmem>>, vector<1x8x32xf32>
    %69 = vector.shape_cast %68 : vector<1x8x32xf32> to vector<8x32xf32>
    %c1_53 = arith.constant 1 : index
    %c0_54 = arith.constant 0 : index
    %c0_55 = arith.constant 0 : index
    %70 = vector.load %arg2[%c1_53, %c0_54, %c0_55] : memref<2x8x32xi32, #tpu.memory_space<vmem>>, vector<1x8x32xi32>
    %71 = vector.shape_cast %70 : vector<1x8x32xi32> to vector<8x32xi32>
    %cst_56 = arith.constant 0.000000e+00 : f32
    %72 = vector.broadcast %cst_56 : f32 to vector<16x64xf32>
    %cst_57 = arith.constant 0.000000e+00 : f32
    %73 = vector.broadcast %cst_57 : f32 to vector<8x64xf32>
    %c0_58 = arith.constant 0 : index
    %c0_59 = arith.constant 0 : index
    %74 = vector.load %arg3[%c0_58, %c0_59] : memref<8x32xi32, #tpu.memory_space<vmem>>, vector<8x32xi32>
    %c0_i32_60 = arith.constant 0 : i32
    %75 = vector.broadcast %c0_i32_60 : i32 to vector<8x32xi32>
    %76 = arith.addi %74, %75 : vector<8x32xi32>
    %77 = arith.cmpi eq, %71, %76 : vector<8x32xi32>
    %cst_61 = arith.constant 0.000000e+00 : f32
    %78 = vector.broadcast %cst_61 : f32 to vector<8x32xf32>
    %79 = arith.select %77, %69, %78 : vector<8x32xi1>, vector<8x32xf32>
    %80 = arith.truncf %79 : vector<8x32xf32> to vector<8x32xbf16>
    %c0_62 = arith.constant 0 : index
    %c0_63 = arith.constant 0 : index
    %c0_64 = arith.constant 0 : index
    %81 = vector.load %arg5[%c0_62, %c0_63, %c0_64] : memref<2x32x64xbf16, #tpu.memory_space<vmem>>, vector<1x32x64xbf16>
    %82 = vector.shape_cast %81 : vector<1x32x64xbf16> to vector<32x64xbf16>
    %cst_65 = arith.constant dense<0.000000e+00> : vector<8x64xf32>
    %83 = tpu.matmul %80, %82, %cst_65 {dimension_numbers = #tpu.dot_dimension_numbers<[1], [0], [0], [1], [0, 0, 1, 1], [], []>} : vector<8x32xbf16>, vector<32x64xbf16>, vector<8x64xf32> -> vector<8x64xf32>
    %84 = arith.addf %73, %83 : vector<8x64xf32>
    %c0_66 = arith.constant 0 : index
    %c0_67 = arith.constant 0 : index
    %85 = vector.load %arg3[%c0_66, %c0_67] : memref<8x32xi32, #tpu.memory_space<vmem>>, vector<8x32xi32>
    %c1_i32_68 = arith.constant 1 : i32
    %86 = vector.broadcast %c1_i32_68 : i32 to vector<8x32xi32>
    %87 = arith.addi %85, %86 : vector<8x32xi32>
    %88 = arith.cmpi eq, %71, %87 : vector<8x32xi32>
    %cst_69 = arith.constant 0.000000e+00 : f32
    %89 = vector.broadcast %cst_69 : f32 to vector<8x32xf32>
    %90 = arith.select %88, %69, %89 : vector<8x32xi1>, vector<8x32xf32>
    %91 = arith.truncf %90 : vector<8x32xf32> to vector<8x32xbf16>
    %c1_70 = arith.constant 1 : index
    %c0_71 = arith.constant 0 : index
    %c0_72 = arith.constant 0 : index
    %92 = vector.load %arg5[%c1_70, %c0_71, %c0_72] : memref<2x32x64xbf16, #tpu.memory_space<vmem>>, vector<1x32x64xbf16>
    %93 = vector.shape_cast %92 : vector<1x32x64xbf16> to vector<32x64xbf16>
    %cst_73 = arith.constant dense<0.000000e+00> : vector<8x64xf32>
    %94 = tpu.matmul %91, %93, %cst_73 {dimension_numbers = #tpu.dot_dimension_numbers<[1], [0], [0], [1], [0, 0, 1, 1], [], []>} : vector<8x32xbf16>, vector<32x64xbf16>, vector<8x64xf32> -> vector<8x64xf32>
    %95 = arith.addf %84, %94 : vector<8x64xf32>
    %c0_74 = arith.constant 0 : index
    %c0_75 = arith.constant 0 : index
    %c0_76 = arith.constant 0 : index
    %96 = vector.load %arg4[%c0_74, %c0_75, %c0_76] : memref<2x16x8xbf16, #tpu.memory_space<vmem>>, vector<1x16x8xbf16>
    %97 = vector.shape_cast %96 : vector<1x16x8xbf16> to vector<16x8xbf16>
    %98 = arith.truncf %95 : vector<8x64xf32> to vector<8x64xbf16>
    %cst_77 = arith.constant dense<0.000000e+00> : vector<16x64xf32>
    %99 = tpu.matmul %97, %98, %cst_77 {dimension_numbers = #tpu.dot_dimension_numbers<[1], [0], [0], [1], [0, 0, 1, 1], [], []>} : vector<16x8xbf16>, vector<8x64xbf16>, vector<16x64xf32> -> vector<16x64xf32>
    %100 = arith.addf %72, %99 : vector<16x64xf32>
    %cst_78 = arith.constant 0.000000e+00 : f32
    %101 = vector.broadcast %cst_78 : f32 to vector<8x64xf32>
    %c0_79 = arith.constant 0 : index
    %c0_80 = arith.constant 0 : index
    %102 = vector.load %arg3[%c0_79, %c0_80] : memref<8x32xi32, #tpu.memory_space<vmem>>, vector<8x32xi32>
    %c16_i32_81 = arith.constant 16 : i32
    %103 = vector.broadcast %c16_i32_81 : i32 to vector<8x32xi32>
    %104 = arith.addi %102, %103 : vector<8x32xi32>
    %105 = arith.cmpi eq, %71, %104 : vector<8x32xi32>
    %cst_82 = arith.constant 0.000000e+00 : f32
    %106 = vector.broadcast %cst_82 : f32 to vector<8x32xf32>
    %107 = arith.select %105, %69, %106 : vector<8x32xi1>, vector<8x32xf32>
    %108 = arith.truncf %107 : vector<8x32xf32> to vector<8x32xbf16>
    %c0_83 = arith.constant 0 : index
    %c0_84 = arith.constant 0 : index
    %c0_85 = arith.constant 0 : index
    %109 = vector.load %arg5[%c0_83, %c0_84, %c0_85] : memref<2x32x64xbf16, #tpu.memory_space<vmem>>, vector<1x32x64xbf16>
    %110 = vector.shape_cast %109 : vector<1x32x64xbf16> to vector<32x64xbf16>
    %cst_86 = arith.constant dense<0.000000e+00> : vector<8x64xf32>
    %111 = tpu.matmul %108, %110, %cst_86 {dimension_numbers = #tpu.dot_dimension_numbers<[1], [0], [0], [1], [0, 0, 1, 1], [], []>} : vector<8x32xbf16>, vector<32x64xbf16>, vector<8x64xf32> -> vector<8x64xf32>
    %112 = arith.addf %101, %111 : vector<8x64xf32>
    %c0_87 = arith.constant 0 : index
    %c0_88 = arith.constant 0 : index
    %113 = vector.load %arg3[%c0_87, %c0_88] : memref<8x32xi32, #tpu.memory_space<vmem>>, vector<8x32xi32>
    %c17_i32_89 = arith.constant 17 : i32
    %114 = vector.broadcast %c17_i32_89 : i32 to vector<8x32xi32>
    %115 = arith.addi %113, %114 : vector<8x32xi32>
    %116 = arith.cmpi eq, %71, %115 : vector<8x32xi32>
    %cst_90 = arith.constant 0.000000e+00 : f32
    %117 = vector.broadcast %cst_90 : f32 to vector<8x32xf32>
    %118 = arith.select %116, %69, %117 : vector<8x32xi1>, vector<8x32xf32>
    %119 = arith.truncf %118 : vector<8x32xf32> to vector<8x32xbf16>
    %c1_91 = arith.constant 1 : index
    %c0_92 = arith.constant 0 : index
    %c0_93 = arith.constant 0 : index
    %120 = vector.load %arg5[%c1_91, %c0_92, %c0_93] : memref<2x32x64xbf16, #tpu.memory_space<vmem>>, vector<1x32x64xbf16>
    %121 = vector.shape_cast %120 : vector<1x32x64xbf16> to vector<32x64xbf16>
    %cst_94 = arith.constant dense<0.000000e+00> : vector<8x64xf32>
    %122 = tpu.matmul %119, %121, %cst_94 {dimension_numbers = #tpu.dot_dimension_numbers<[1], [0], [0], [1], [0, 0, 1, 1], [], []>} : vector<8x32xbf16>, vector<32x64xbf16>, vector<8x64xf32> -> vector<8x64xf32>
    %123 = arith.addf %112, %122 : vector<8x64xf32>
    %c1_95 = arith.constant 1 : index
    %c0_96 = arith.constant 0 : index
    %c0_97 = arith.constant 0 : index
    %124 = vector.load %arg4[%c1_95, %c0_96, %c0_97] : memref<2x16x8xbf16, #tpu.memory_space<vmem>>, vector<1x16x8xbf16>
    %125 = vector.shape_cast %124 : vector<1x16x8xbf16> to vector<16x8xbf16>
    %126 = arith.truncf %123 : vector<8x64xf32> to vector<8x64xbf16>
    %cst_98 = arith.constant dense<0.000000e+00> : vector<16x64xf32>
    %127 = tpu.matmul %125, %126, %cst_98 {dimension_numbers = #tpu.dot_dimension_numbers<[1], [0], [0], [1], [0, 0, 1, 1], [], []>} : vector<16x8xbf16>, vector<8x64xbf16>, vector<16x64xf32> -> vector<16x64xf32>
    %128 = arith.addf %100, %127 : vector<16x64xf32>
    %129 = arith.truncf %128 : vector<16x64xf32> to vector<16x64xbf16>
    %c19 = arith.constant 19 : index
    %c0_99 = arith.constant 0 : index
    %130 = vector.load %arg17[%c19, %c0_99] : memref<36x64xbf16, #tpu.memory_space<vmem>>, vector<16x64xbf16>
    tpu.vector_store %arg17[%c19, %c0_99], %129 {strides = array<i32>} : memref<36x64xbf16, #tpu.memory_space<vmem>>, vector<16x64xbf16>,
    %cst_100 = arith.constant 0.000000e+00 : f32
    %131 = vector.broadcast %cst_100 : f32 to vector<34x64xf32>
    %c0_101 = arith.constant 0 : index
    %c0_102 = arith.constant 0 : index
    %132 = vector.load %arg17[%c0_101, %c0_102] : memref<36x64xbf16, #tpu.memory_space<vmem>>, vector<34x64xbf16>
    %c0_103 = arith.constant 0 : index
    %c0_104 = arith.constant 0 : index
    %c0_105 = arith.constant 0 : index
    %133 = vector.load %arg7[%c0_103, %c0_104, %c0_105] : memref<3x64x64xbf16, #tpu.memory_space<vmem>>, vector<1x64x64xbf16>
    %134 = vector.shape_cast %133 : vector<1x64x64xbf16> to vector<64x64xbf16>
    %cst_106 = arith.constant dense<0.000000e+00> : vector<34x64xf32>
    %135 = tpu.matmul %132, %134, %cst_106 {dimension_numbers = #tpu.dot_dimension_numbers<[1], [0], [0], [1], [0, 0, 1, 1], [], []>} : vector<34x64xbf16>, vector<64x64xbf16>, vector<34x64xf32> -> vector<34x64xf32>
    %136 = arith.addf %131, %135 : vector<34x64xf32>
    %c1_107 = arith.constant 1 : index
    %c0_108 = arith.constant 0 : index
    %137 = vector.load %arg17[%c1_107, %c0_108] : memref<36x64xbf16, #tpu.memory_space<vmem>>, vector<34x64xbf16>
    %c1_109 = arith.constant 1 : index
    %c0_110 = arith.constant 0 : index
    %c0_111 = arith.constant 0 : index
    %138 = vector.load %arg7[%c1_109, %c0_110, %c0_111] : memref<3x64x64xbf16, #tpu.memory_space<vmem>>, vector<1x64x64xbf16>
    %139 = vector.shape_cast %138 : vector<1x64x64xbf16> to vector<64x64xbf16>
    %cst_112 = arith.constant dense<0.000000e+00> : vector<34x64xf32>
    %140 = tpu.matmul %137, %139, %cst_112 {dimension_numbers = #tpu.dot_dimension_numbers<[1], [0], [0], [1], [0, 0, 1, 1], [], []>} : vector<34x64xbf16>, vector<64x64xbf16>, vector<34x64xf32> -> vector<34x64xf32>
    %141 = arith.addf %136, %140 : vector<34x64xf32>
    %c2 = arith.constant 2 : index
    %c0_113 = arith.constant 0 : index
    %142 = vector.load %arg17[%c2, %c0_113] : memref<36x64xbf16, #tpu.memory_space<vmem>>, vector<34x64xbf16>
    %c2_114 = arith.constant 2 : index
    %c0_115 = arith.constant 0 : index
    %c0_116 = arith.constant 0 : index
    %143 = vector.load %arg7[%c2_114, %c0_115, %c0_116] : memref<3x64x64xbf16, #tpu.memory_space<vmem>>, vector<1x64x64xbf16>
    %144 = vector.shape_cast %143 : vector<1x64x64xbf16> to vector<64x64xbf16>
    %cst_117 = arith.constant dense<0.000000e+00> : vector<34x64xf32>
    %145 = tpu.matmul %142, %144, %cst_117 {dimension_numbers = #tpu.dot_dimension_numbers<[1], [0], [0], [1], [0, 0, 1, 1], [], []>} : vector<34x64xbf16>, vector<64x64xbf16>, vector<34x64xf32> -> vector<34x64xf32>
    %146 = arith.addf %141, %145 : vector<34x64xf32>
    %c0_118 = arith.constant 0 : index
    %c0_119 = arith.constant 0 : index
    %147 = vector.load %arg8[%c0_118, %c0_119] : memref<1x64xf32, #tpu.memory_space<vmem>>, vector<1x64xf32>
    %148 = vector.broadcast %147 : vector<1x64xf32> to vector<34x64xf32>
    %149 = arith.mulf %146, %148 : vector<34x64xf32>
    %c0_120 = arith.constant 0 : index
    %c0_121 = arith.constant 0 : index
    %150 = vector.load %arg9[%c0_120, %c0_121] : memref<1x64xf32, #tpu.memory_space<vmem>>, vector<1x64xf32>
    %151 = vector.broadcast %150 : vector<1x64xf32> to vector<34x64xf32>
    %152 = arith.addf %149, %151 : vector<34x64xf32>
    %cst_122 = arith.constant 0.000000e+00 : f32
    %153 = vector.broadcast %cst_122 : f32 to vector<34x64xf32>
    %154 = arith.maximumf %152, %153 : vector<34x64xf32>
    %c0_123 = arith.constant 0 : index
    %c0_124 = arith.constant 0 : index
    %155 = vector.load %arg6[%c0_123, %c0_124] : memref<34x1xf32, #tpu.memory_space<vmem>>, vector<34x1xf32>
    %156 = vector.broadcast %155 : vector<34x1xf32> to vector<34x64xf32>
    %157 = arith.mulf %154, %156 : vector<34x64xf32>
    %158 = arith.truncf %157 : vector<34x64xf32> to vector<34x64xbf16>
    %c1_125 = arith.constant 1 : index
    %c0_126 = arith.constant 0 : index
    %159 = vector.load %arg17[%c1_125, %c0_126] : memref<36x64xbf16, #tpu.memory_space<vmem>>, vector<34x64xbf16>
    tpu.vector_store %arg17[%c1_125, %c0_126], %158 {strides = array<i32>} : memref<36x64xbf16, #tpu.memory_space<vmem>>, vector<34x64xbf16>,
    %cst_127 = arith.constant 0.000000e+00 : f32
    %160 = vector.broadcast %cst_127 : f32 to vector<34x64xf32>
    %c0_128 = arith.constant 0 : index
    %c0_129 = arith.constant 0 : index
    %161 = vector.load %arg17[%c0_128, %c0_129] : memref<36x64xbf16, #tpu.memory_space<vmem>>, vector<34x64xbf16>
    %c0_130 = arith.constant 0 : index
    %c0_131 = arith.constant 0 : index
    %c0_132 = arith.constant 0 : index
    %162 = vector.load %arg10[%c0_130, %c0_131, %c0_132] : memref<3x64x64xbf16, #tpu.memory_space<vmem>>, vector<1x64x64xbf16>
    %163 = vector.shape_cast %162 : vector<1x64x64xbf16> to vector<64x64xbf16>
    %cst_133 = arith.constant dense<0.000000e+00> : vector<34x64xf32>
    %164 = tpu.matmul %161, %163, %cst_133 {dimension_numbers = #tpu.dot_dimension_numbers<[1], [0], [0], [1], [0, 0, 1, 1], [], []>} : vector<34x64xbf16>, vector<64x64xbf16>, vector<34x64xf32> -> vector<34x64xf32>
    %165 = arith.addf %160, %164 : vector<34x64xf32>
    %c1_134 = arith.constant 1 : index
    %c0_135 = arith.constant 0 : index
    %166 = vector.load %arg17[%c1_134, %c0_135] : memref<36x64xbf16, #tpu.memory_space<vmem>>, vector<34x64xbf16>
    %c1_136 = arith.constant 1 : index
    %c0_137 = arith.constant 0 : index
    %c0_138 = arith.constant 0 : index
    %167 = vector.load %arg10[%c1_136, %c0_137, %c0_138] : memref<3x64x64xbf16, #tpu.memory_space<vmem>>, vector<1x64x64xbf16>
    %168 = vector.shape_cast %167 : vector<1x64x64xbf16> to vector<64x64xbf16>
    %cst_139 = arith.constant dense<0.000000e+00> : vector<34x64xf32>
    %169 = tpu.matmul %166, %168, %cst_139 {dimension_numbers = #tpu.dot_dimension_numbers<[1], [0], [0], [1], [0, 0, 1, 1], [], []>} : vector<34x64xbf16>, vector<64x64xbf16>, vector<34x64xf32> -> vector<34x64xf32>
    %170 = arith.addf %165, %169 : vector<34x64xf32>
    %c2_140 = arith.constant 2 : index
    %c0_141 = arith.constant 0 : index
    %171 = vector.load %arg17[%c2_140, %c0_141] : memref<36x64xbf16, #tpu.memory_space<vmem>>, vector<34x64xbf16>
    %c2_142 = arith.constant 2 : index
    %c0_143 = arith.constant 0 : index
    %c0_144 = arith.constant 0 : index
    %172 = vector.load %arg10[%c2_142, %c0_143, %c0_144] : memref<3x64x64xbf16, #tpu.memory_space<vmem>>, vector<1x64x64xbf16>
    %173 = vector.shape_cast %172 : vector<1x64x64xbf16> to vector<64x64xbf16>
    %cst_145 = arith.constant dense<0.000000e+00> : vector<34x64xf32>
    %174 = tpu.matmul %171, %173, %cst_145 {dimension_numbers = #tpu.dot_dimension_numbers<[1], [0], [0], [1], [0, 0, 1, 1], [], []>} : vector<34x64xbf16>, vector<64x64xbf16>, vector<34x64xf32> -> vector<34x64xf32>
    %175 = arith.addf %170, %174 : vector<34x64xf32>
    %c0_146 = arith.constant 0 : index
    %c0_147 = arith.constant 0 : index
    %176 = vector.load %arg11[%c0_146, %c0_147] : memref<1x64xf32, #tpu.memory_space<vmem>>, vector<1x64xf32>
    %177 = vector.broadcast %176 : vector<1x64xf32> to vector<34x64xf32>
    %178 = arith.mulf %175, %177 : vector<34x64xf32>
    %c0_148 = arith.constant 0 : index
    %c0_149 = arith.constant 0 : index
    %179 = vector.load %arg12[%c0_148, %c0_149] : memref<1x64xf32, #tpu.memory_space<vmem>>, vector<1x64xf32>
    %180 = vector.broadcast %179 : vector<1x64xf32> to vector<34x64xf32>
    %181 = arith.addf %178, %180 : vector<34x64xf32>
    %cst_150 = arith.constant 0.000000e+00 : f32
    %182 = vector.broadcast %cst_150 : f32 to vector<34x64xf32>
    %183 = arith.maximumf %181, %182 : vector<34x64xf32>
    %c0_151 = arith.constant 0 : index
    %c0_152 = arith.constant 0 : index
    %184 = vector.load %arg6[%c0_151, %c0_152] : memref<34x1xf32, #tpu.memory_space<vmem>>, vector<34x1xf32>
    %185 = vector.broadcast %184 : vector<34x1xf32> to vector<34x64xf32>
    %186 = arith.mulf %183, %185 : vector<34x64xf32>
    %187 = arith.truncf %186 : vector<34x64xf32> to vector<34x64xbf16>
    %c1_153 = arith.constant 1 : index
    %c0_154 = arith.constant 0 : index
    %188 = vector.load %arg17[%c1_153, %c0_154] : memref<36x64xbf16, #tpu.memory_space<vmem>>, vector<34x64xbf16>
    tpu.vector_store %arg17[%c1_153, %c0_154], %187 {strides = array<i32>} : memref<36x64xbf16, #tpu.memory_space<vmem>>, vector<34x64xbf16>,
    %cst_155 = arith.constant 0.000000e+00 : f32
    %189 = vector.broadcast %cst_155 : f32 to vector<34x128xf32>
    %c0_156 = arith.constant 0 : index
    %c0_157 = arith.constant 0 : index
    %190 = vector.load %arg17[%c0_156, %c0_157] : memref<36x64xbf16, #tpu.memory_space<vmem>>, vector<34x64xbf16>
    %c0_158 = arith.constant 0 : index
    %c0_159 = arith.constant 0 : index
    %c0_160 = arith.constant 0 : index
    %191 = vector.load %arg13[%c0_158, %c0_159, %c0_160] : memref<3x64x128xbf16, #tpu.memory_space<vmem>>, vector<1x64x128xbf16>
    %192 = vector.shape_cast %191 : vector<1x64x128xbf16> to vector<64x128xbf16>
    %cst_161 = arith.constant dense<0.000000e+00> : vector<34x128xf32>
    %193 = tpu.matmul %190, %192, %cst_161 {dimension_numbers = #tpu.dot_dimension_numbers<[1], [0], [0], [1], [0, 0, 1, 1], [], []>} : vector<34x64xbf16>, vector<64x128xbf16>, vector<34x128xf32> -> vector<34x128xf32>
    %194 = arith.addf %189, %193 : vector<34x128xf32>
    %c1_162 = arith.constant 1 : index
    %c0_163 = arith.constant 0 : index
    %195 = vector.load %arg17[%c1_162, %c0_163] : memref<36x64xbf16, #tpu.memory_space<vmem>>, vector<34x64xbf16>
    %c1_164 = arith.constant 1 : index
    %c0_165 = arith.constant 0 : index
    %c0_166 = arith.constant 0 : index
    %196 = vector.load %arg13[%c1_164, %c0_165, %c0_166] : memref<3x64x128xbf16, #tpu.memory_space<vmem>>, vector<1x64x128xbf16>
    %197 = vector.shape_cast %196 : vector<1x64x128xbf16> to vector<64x128xbf16>
    %cst_167 = arith.constant dense<0.000000e+00> : vector<34x128xf32>
    %198 = tpu.matmul %195, %197, %cst_167 {dimension_numbers = #tpu.dot_dimension_numbers<[1], [0], [0], [1], [0, 0, 1, 1], [], []>} : vector<34x64xbf16>, vector<64x128xbf16>, vector<34x128xf32> -> vector<34x128xf32>
    %199 = arith.addf %194, %198 : vector<34x128xf32>
    %c2_168 = arith.constant 2 : index
    %c0_169 = arith.constant 0 : index
    %200 = vector.load %arg17[%c2_168, %c0_169] : memref<36x64xbf16, #tpu.memory_space<vmem>>, vector<34x64xbf16>
    %c2_170 = arith.constant 2 : index
    %c0_171 = arith.constant 0 : index
    %c0_172 = arith.constant 0 : index
    %201 = vector.load %arg13[%c2_170, %c0_171, %c0_172] : memref<3x64x128xbf16, #tpu.memory_space<vmem>>, vector<1x64x128xbf16>
    %202 = vector.shape_cast %201 : vector<1x64x128xbf16> to vector<64x128xbf16>
    %cst_173 = arith.constant dense<0.000000e+00> : vector<34x128xf32>
    %203 = tpu.matmul %200, %202, %cst_173 {dimension_numbers = #tpu.dot_dimension_numbers<[1], [0], [0], [1], [0, 0, 1, 1], [], []>} : vector<34x64xbf16>, vector<64x128xbf16>, vector<34x128xf32> -> vector<34x128xf32>
    %204 = arith.addf %199, %203 : vector<34x128xf32>
    %c0_174 = arith.constant 0 : index
    %c0_175 = arith.constant 0 : index
    %205 = vector.load %arg14[%c0_174, %c0_175] : memref<1x128xf32, #tpu.memory_space<vmem>>, vector<1x128xf32>
    %206 = vector.broadcast %205 : vector<1x128xf32> to vector<34x128xf32>
    %207 = arith.mulf %204, %206 : vector<34x128xf32>
    %c0_176 = arith.constant 0 : index
    %c0_177 = arith.constant 0 : index
    %208 = vector.load %arg15[%c0_176, %c0_177] : memref<1x128xf32, #tpu.memory_space<vmem>>, vector<1x128xf32>
    %209 = vector.broadcast %208 : vector<1x128xf32> to vector<34x128xf32>
    %210 = arith.addf %207, %209 : vector<34x128xf32>
    %cst_178 = arith.constant 0.000000e+00 : f32
    %211 = vector.broadcast %cst_178 : f32 to vector<34x128xf32>
    %212 = arith.maximumf %210, %211 : vector<34x128xf32>
    %213 = vector.extract_strided_slice %212 {offsets = [0, 0], sizes = [16, 128], strides = [1, 1]} : vector<34x128xf32> to vector<16x128xf32>
    %c0_179 = arith.constant 0 : index
    %c0_180 = arith.constant 0 : index
    %c0_181 = arith.constant 0 : index
    %214 = vector.load %arg16[%c0_179, %c0_180, %c0_181] : memref<2x16x128xf32, #tpu.memory_space<vmem>>, vector<1x16x128xf32>
    %215 = vector.shape_cast %214 : vector<1x16x128xf32> to vector<16x128xf32>
    %216 = vector.shape_cast %213 : vector<16x128xf32> to vector<1x16x128xf32>
    tpu.vector_store %arg16[%c0_179, %c0_180, %c0_181], %216 {strides = array<i32>} : memref<2x16x128xf32, #tpu.memory_space<vmem>>, vector<1x16x128xf32>,
    %217 = vector.extract_strided_slice %212 {offsets = [18, 0], sizes = [16, 128], strides = [1, 1]} : vector<34x128xf32> to vector<16x128xf32>
    %c1_182 = arith.constant 1 : index
    %c0_183 = arith.constant 0 : index
    %c0_184 = arith.constant 0 : index
    %218 = vector.load %arg16[%c1_182, %c0_183, %c0_184] : memref<2x16x128xf32, #tpu.memory_space<vmem>>, vector<1x16x128xf32>
    %219 = vector.shape_cast %218 : vector<1x16x128xf32> to vector<16x128xf32>
    %220 = vector.shape_cast %217 : vector<16x128xf32> to vector<1x16x128xf32>
    tpu.vector_store %arg16[%c1_182, %c0_183, %c0_184], %220 {strides = array<i32>} : memref<2x16x128xf32, #tpu.memory_space<vmem>>, vector<1x16x128xf32>,
    return
  }
  func.func @transform_0(%arg0: i32) -> (i32, i32, i32) {
    %c0_i32 = arith.constant 0 : i32
    %c0_i32_0 = arith.constant 0 : i32
    %c0_i32_1 = arith.constant 0 : i32
    return %arg0, %c0_i32, %c0_i32_0 : i32, i32, i32
  }
  func.func @transform_1(%arg0: i32) -> (i32, i32, i32) {
    %c0_i32 = arith.constant 0 : i32
    %c0_i32_0 = arith.constant 0 : i32
    %c0_i32_1 = arith.constant 0 : i32
    return %arg0, %c0_i32, %c0_i32_0 : i32, i32, i32
  }
  func.func @transform_2(%arg0: i32) -> (i32, i32) {
    %c0_i32 = arith.constant 0 : i32
    %c0_i32_0 = arith.constant 0 : i32
    %c0_i32_1 = arith.constant 0 : i32
    return %c0_i32, %c0_i32_0 : i32, i32
  }
  func.func @transform_3(%arg0: i32) -> (i32, i32, i32) {
    %c0_i32 = arith.constant 0 : i32
    %c0_i32_0 = arith.constant 0 : i32
    %c0_i32_1 = arith.constant 0 : i32
    %c0_i32_2 = arith.constant 0 : i32
    return %c0_i32, %c0_i32_0, %c0_i32_1 : i32, i32, i32
  }
  func.func @transform_4(%arg0: i32) -> (i32, i32, i32) {
    %c0_i32 = arith.constant 0 : i32
    %c0_i32_0 = arith.constant 0 : i32
    %c0_i32_1 = arith.constant 0 : i32
    %c0_i32_2 = arith.constant 0 : i32
    return %c0_i32, %c0_i32_0, %c0_i32_1 : i32, i32, i32
  }
  func.func @transform_5(%arg0: i32) -> (i32, i32) {
    %c0_i32 = arith.constant 0 : i32
    %c0_i32_0 = arith.constant 0 : i32
    %c0_i32_1 = arith.constant 0 : i32
    return %c0_i32, %c0_i32_0 : i32, i32
  }
  func.func @transform_6(%arg0: i32) -> (i32, i32, i32) {
    %c0_i32 = arith.constant 0 : i32
    %c0_i32_0 = arith.constant 0 : i32
    %c0_i32_1 = arith.constant 0 : i32
    %c0_i32_2 = arith.constant 0 : i32
    return %c0_i32, %c0_i32_0, %c0_i32_1 : i32, i32, i32
  }
  func.func @transform_7(%arg0: i32) -> (i32, i32) {
    %c0_i32 = arith.constant 0 : i32
    %c0_i32_0 = arith.constant 0 : i32
    %c0_i32_1 = arith.constant 0 : i32
    return %c0_i32, %c0_i32_0 : i32, i32
  }
  func.func @transform_8(%arg0: i32) -> (i32, i32) {
    %c0_i32 = arith.constant 0 : i32
    %c0_i32_0 = arith.constant 0 : i32
    %c0_i32_1 = arith.constant 0 : i32
    return %c0_i32, %c0_i32_0 : i32, i32
  }
  func.func @transform_9(%arg0: i32) -> (i32, i32, i32) {
    %c0_i32 = arith.constant 0 : i32
    %c0_i32_0 = arith.constant 0 : i32
    %c0_i32_1 = arith.constant 0 : i32
    %c0_i32_2 = arith.constant 0 : i32
    return %c0_i32, %c0_i32_0, %c0_i32_1 : i32, i32, i32
  }
  func.func @transform_10(%arg0: i32) -> (i32, i32) {
    %c0_i32 = arith.constant 0 : i32
    %c0_i32_0 = arith.constant 0 : i32
    %c0_i32_1 = arith.constant 0 : i32
    return %c0_i32, %c0_i32_0 : i32, i32
  }
  func.func @transform_11(%arg0: i32) -> (i32, i32) {
    %c0_i32 = arith.constant 0 : i32
    %c0_i32_0 = arith.constant 0 : i32
    %c0_i32_1 = arith.constant 0 : i32
    return %c0_i32, %c0_i32_0 : i32, i32
  }
  func.func @transform_12(%arg0: i32) -> (i32, i32, i32) {
    %c0_i32 = arith.constant 0 : i32
    %c0_i32_0 = arith.constant 0 : i32
    %c0_i32_1 = arith.constant 0 : i32
    %c0_i32_2 = arith.constant 0 : i32
    return %c0_i32, %c0_i32_0, %c0_i32_1 : i32, i32, i32
  }
  func.func @transform_13(%arg0: i32) -> (i32, i32) {
    %c0_i32 = arith.constant 0 : i32
    %c0_i32_0 = arith.constant 0 : i32
    %c0_i32_1 = arith.constant 0 : i32
    return %c0_i32, %c0_i32_0 : i32, i32
  }
  func.func @transform_14(%arg0: i32) -> (i32, i32) {
    %c0_i32 = arith.constant 0 : i32
    %c0_i32_0 = arith.constant 0 : i32
    %c0_i32_1 = arith.constant 0 : i32
    return %c0_i32, %c0_i32_0 : i32, i32
  }
  func.func @transform_15(%arg0: i32) -> (i32, i32, i32) {
    %c0_i32 = arith.constant 0 : i32
    %c0_i32_0 = arith.constant 0 : i32
    %c0_i32_1 = arith.constant 0 : i32
    return %arg0, %c0_i32, %c0_i32_0 : i32, i32, i32
  }
}

</mosaic_0001>

<bundles_post_ra>
// kernel: tpu_custom_call.1
= control target key start
LH: loop header
LB: loop body
LE: loop exit
PB: predicated region body
PF: predicated region fallthrough
CT: control target
= control target key end

     0   :  { %20 = vsyncpa [#allocation4], 0  ;;  %s3715_s0 = inlined_call_operand.hbm [shape: f32[2,8,32], index: 0, kind: input, shape index: {}]   ;;  %s3716_s1 = inlined_call_operand.hbm [shape: s32[2,8,32], index: 1, kind: input, shape index: {}]   ;;  %s3717_s2 = inlined_call_operand.hbm [shape: s32[8,32], index: 2, kind: input, shape index: {}]   ;;  %s3718_s3 = inlined_call_operand.vmem [shape: bf16[2,16,8], index: 3, kind: input, shape index: {}]   ;;  %s3719_s4 = inlined_call_operand.hbm [shape: bf16[2,32,64], index: 4, kind: input, shape index: {}]   ;;  %s3720_s5 = inlined_call_operand.vmem [shape: f32[34,1], index: 5, kind: input, shape index: {}]   ;;  %s3721_s6 = inlined_call_operand.hbm [shape: bf16[3,64,64], index: 6, kind: input, shape index: {}]   ;;  %s3722_s7 = inlined_call_operand.vmem [shape: f32[1,64], index: 7, kind: input, shape index: {}]   ;;  %s3723_s8 = inlined_call_operand.vmem [shape: f32[1,64], index: 8, kind: input, shape index: {}]   ;;  %s3724_s9 = inlined_call_operand.vmem [shape: bf16[3,64,64], index: 9, kind: input, shape index: {}]   ;;  %s3725_s10 = inlined_call_operand.vmem [shape: f32[1,64], index: 10, kind: input, shape index: {}]   ;;  %s3726_s11 = inlined_call_operand.vmem [shape: f32[1,64], index: 11, kind: input, shape index: {}]   ;;  %s3727_s12 = inlined_call_operand.hbm [shape: bf16[3,64,128], index: 12, kind: input, shape index: {}]   ;;  %s3728_s13 = inlined_call_operand.vmem [shape: f32[1,128], index: 13, kind: input, shape index: {}]   ;;  %s3729_s14 = inlined_call_operand.vmem [shape: f32[1,128], index: 14, kind: input, shape index: {}]   ;;  %s3730_s15 = inlined_call_operand.hbm [shape: f32[2,16,128], index: 15, kind: output, shape index: {}]  }
   0x1   :  { %21 = vsyncpa [#allocation7], 0 }
   0x2   :  { %22 = vsyncpa [#allocation10], 0 }
   0x3   :  { %23 = vsyncpa [#allocation13], 0 }
   0x4   :  { %24 = vsyncpa [#allocation5], 0  ;;  %s3131_s18 = smov [#allocation6]   ;;  %s3132_s20 = smov [#allocation9]  }
   0x5   :  { %s42_s19 = sshll.u32 %s3131_s18, 4  ;;  %s66_s21 = sshll.u32 %s3132_s20, 4  ;;  %s43_s19 = int_to_ptr.vmem [resolvable:$true] %s42_s19  ;;  %s3225_s21 = int_to_ptr.vmem [resolvable:$true] %s66_s21 }
   0x6   :  { %s2967_s24 = scalar_lea.hbm %s3716_s1, 256 }
   0x7   :  { %p2968_p0 = scmp.ne.s32.totalorder %s3716_s1, %s2967_s24  ;;  %p2971_p1 = scmp.lt.u32.totalorder %s2967_s24, %s3716_s1 }
   0x9   :  { %p2973_p2 = pnand %p2971_p1, %p2968_p0 }
   0xb   :  { %2976 = shalt.err (!%p2973_p2)
}
   0xc   :  { %s2977_s29 = scalar_lea.vmem %s43_s19, 256  ;;  %p2982_p4 = scmp.lt.s32.totalorder %s43_s19, %s43_s19 }
   0xd   :  { %p2978_p3 = scmp.ne.s32.totalorder %s43_s19, %s2977_s29  ;;  %p2983_p5 = scmp.lt.s32.totalorder %s2977_s29, %s2977_s29 }
   0xf   :  { %p2984_p6 = por %p2983_p5, %p2982_p4 }
  0x11   :  { %p2985_p7 = pnand %p2984_p6, %p2978_p3 }
  0x13   :  { %2988 = shalt.err (!%p2985_p7)
}
  0x14   :  { %s3731_s30 = smov 128   ;;  %s3733_s16 = smov 8  }
  0x15   :  { %48 = dma.hbm_to_vmem [thread:$0]  %s3716_s1, 256, %s43_s19, [#allocation7], %s3731_s30, %s3731_s30, %s3733_s16  }
  0x16   :  { %s2989_s23 = scalar_lea.hbm %s3719_s4, 512 }
  0x17   :  { %p2990_p8 = scmp.ne.s32.totalorder %s3719_s4, %s2989_s23  ;;  %p2993_p9 = scmp.lt.u32.totalorder %s2989_s23, %s3719_s4 }
  0x19   :  { %p2995_p10 = pnand %p2993_p9, %p2990_p8 }
  0x1b   :  { %2998 = shalt.err (!%p2995_p10)
}
  0x1c   :  { %s2999_s28 = scalar_lea.vmem %s3225_s21, 512  ;;  %p3004_p12 = scmp.lt.s32.totalorder %s3225_s21, %s3225_s21 }
  0x1d   :  { %p3000_p11 = scmp.ne.s32.totalorder %s3225_s21, %s2999_s28  ;;  %p3005_p13 = scmp.lt.s32.totalorder %s2999_s28, %s2999_s28 }
  0x1f   :  { %p3006_p0 = por %p3005_p13, %p3004_p12 }
  0x21   :  { %p3007_p1 = pnand %p3006_p0, %p3000_p11 }
  0x23   :  { %3010 = shalt.err (!%p3007_p1)
}
  0x24   :  { %s3135_s1 = smov 64   ;;  %s3136_s19 = smov 4  }
  0x25   :  { %72 = dma.hbm_to_vmem [thread:$0]  %s3719_s4, 512, %s3225_s21, [#allocation10], %s3135_s1, %s3135_s1, %s3136_s19  }
  0x26   :  { %s3137_s18 = smov [#allocation3]   ;;  %s3138_s22 = smov [#allocation8]  }
  0x27   :  { %s30_s20 = sshll.u32 %s3137_s18, 4  ;;  %s55_s23 = sshll.u32 %s3138_s22, 4  ;;  %s31_s20 = int_to_ptr.vmem [resolvable:$true] %s30_s20  ;;  %s56_s23 = int_to_ptr.vmem [resolvable:$true] %s55_s23 }
  0x28   :  { %s3011_s26 = scalar_lea.hbm %s3715_s0, 256 }
  0x29   :  { %p3012_p2 = scmp.ne.s32.totalorder %s3715_s0, %s3011_s26  ;;  %p3015_p3 = scmp.lt.u32.totalorder %s3011_s26, %s3715_s0 }
  0x2b   :  { %p3017_p4 = pnand %p3015_p3, %p3012_p2 }
  0x2d   :  { %3020 = shalt.err (!%p3017_p4)
}
  0x2e   :  { %s3021_s4 = scalar_lea.vmem %s31_s20, 256  ;;  %p3026_p6 = scmp.lt.s32.totalorder %s31_s20, %s31_s20 }
  0x2f   :  { %p3022_p5 = scmp.ne.s32.totalorder %s31_s20, %s3021_s4  ;;  %p3027_p7 = scmp.lt.s32.totalorder %s3021_s4, %s3021_s4 }
  0x31   :  { %p3028_p8 = por %p3027_p7, %p3026_p6 }
  0x33   :  { %p3029_p9 = pnand %p3028_p8, %p3022_p5 }
  0x35   :  { %3032 = shalt.err (!%p3029_p9)
}
  0x36   :  { %s3735_s21 = smov 8   ;;  %s3736_s29 = smov 128  }
  0x37   :  { %36 = dma.hbm_to_vmem [thread:$0]  %s3715_s0, 256, %s31_s20, [#allocation4], %s3736_s29, %s3736_s29, %s3735_s21  }
  0x38   :  { %s3033_s30 = scalar_lea.hbm %s3717_s2, 128 }
  0x39   :  { %p3034_p10 = scmp.ne.s32.totalorder %s3717_s2, %s3033_s30  ;;  %p3037_p11 = scmp.lt.u32.totalorder %s3033_s30, %s3717_s2 }
  0x3b   :  { %p3039_p12 = pnand %p3037_p11, %p3034_p10 }
  0x3d   :  { %3042 = shalt.err (!%p3039_p12)
}
  0x3e   :  { %s3043_s28 = scalar_lea.vmem %s56_s23, 128  ;;  %p3048_p0 = scmp.lt.s32.totalorder %s56_s23, %s56_s23 }
  0x3f   :  { %p3044_p13 = scmp.ne.s32.totalorder %s56_s23, %s3043_s28  ;;  %p3049_p1 = scmp.lt.s32.totalorder %s3043_s28, %s3043_s28 }
  0x41   :  { %p3050_p2 = por %p3049_p1, %p3048_p0 }
  0x43   :  { %p3051_p3 = pnand %p3050_p2, %p3044_p13 }
  0x45   :  { %3054 = shalt.err (!%p3051_p3)
}
  0x46   :  { %58 = dma.hbm_to_vmem [thread:$0]  %s3717_s2, 128, %s56_s23, [#allocation7]  }
  0x47   :  { %s3139_s4 = smov [#allocation11]   ;;  %s3140_s18 = smov [#allocation12]  }
  0x48   :  { %s80_s17 = sshll.u32 %s3139_s4, 4  ;;  %s102_s22 = sshll.u32 %s3140_s18, 4  ;;  %s81_s17 = int_to_ptr.vmem [resolvable:$true] %s80_s17  ;;  %s3289_s22 = int_to_ptr.vmem [resolvable:$true] %s102_s22 }
  0x49   :  { %s3055_s16 = scalar_lea.hbm %s3721_s6, 1536 }
  0x4a   :  { %p3056_p4 = scmp.ne.s32.totalorder %s3721_s6, %s3055_s16  ;;  %p3059_p5 = scmp.lt.u32.totalorder %s3055_s16, %s3721_s6 }
  0x4c   :  { %p3061_p6 = pnand %p3059_p5, %p3056_p4 }
  0x4e   :  { %3064 = shalt.err (!%p3061_p6)
}
  0x4f   :  { %s3065_s2 = scalar_lea.vmem %s81_s17, 1536  ;;  %p3070_p8 = scmp.lt.s32.totalorder %s81_s17, %s81_s17 }
  0x50   :  { %p3066_p7 = scmp.ne.s32.totalorder %s81_s17, %s3065_s2  ;;  %p3071_p9 = scmp.lt.s32.totalorder %s3065_s2, %s3065_s2 }
  0x52   :  { %p3072_p10 = por %p3071_p9, %p3070_p8 }
  0x54   :  { %p3073_p11 = pnand %p3072_p10, %p3066_p7 }
  0x56   :  { %3076 = shalt.err (!%p3073_p11)
}
  0x57   :  { %86 = dma.hbm_to_vmem [thread:$0]  %s3721_s6, 1536, %s81_s17, [#allocation10], %s3135_s1, %s3135_s1, %s3136_s19  }
  0x58   :  { %s3077_s18 = scalar_lea.hbm %s3727_s12, 1536 }
  0x59   :  { %p3078_p12 = scmp.ne.s32.totalorder %s3727_s12, %s3077_s18  ;;  %p3081_p13 = scmp.lt.u32.totalorder %s3077_s18, %s3727_s12 }
  0x5b   :  { %p3083_p0 = pnand %p3081_p13, %p3078_p12 }
  0x5d   :  { %3086 = shalt.err (!%p3083_p0)
}
  0x5e   :  { %s3087_s26 = scalar_lea.vmem %s3289_s22, 1536  ;;  %p3092_p2 = scmp.lt.s32.totalorder %s3289_s22, %s3289_s22 }
  0x5f   :  { %p3088_p1 = scmp.ne.s32.totalorder %s3289_s22, %s3087_s26  ;;  %p3093_p3 = scmp.lt.s32.totalorder %s3087_s26, %s3087_s26 }
  0x61   :  { %p3094_p4 = por %p3093_p3, %p3092_p2 }
  0x63   :  { %p3095_p5 = pnand %p3094_p4, %p3088_p1 }
  0x65   :  { %3098 = shalt.err (!%p3095_p5)
}
  0x66   :  { %108 = dma.hbm_to_vmem [thread:$0]  %s3727_s12, 1536, %s3289_s22, [#allocation13], %s3135_s1, %s3135_s1, %s3136_s19  }
  0x67   :  { %3121 = dma.done.wait [#allocation4], 256  }
  0x68   :  { %3122 = vsyncadd [#allocation4], 4294967040 }
  0x69   :  { %3123 = dma.done.wait [#allocation7], 384  }
  0x6a   :  { %3124 = vsyncadd [#allocation7], 4294966912 }
  0x6b   :  { %3125 = dma.done.wait [#allocation10], 2048  }
  0x6c   :  { %3126 = vsyncadd [#allocation10], 4294965248 }
  0x6d   :  { %3127 = dma.done.wait [#allocation13], 1536  }
  0x6e   :  { %3128 = vsyncadd [#allocation13], 4294965760  ;;  %v3141_v0 = vmov 0.0   ;;  %vm3142_vm0 = vmmov 0   ;;  %v2905_v1 = vld [vmem:[#allocation9 + $0x10] sm:$0xff]   ;;  %v2906_v2 = vld [vmem:[#allocation9] sm:$0xff]  }
  0x6f   :  { %2535 = vmatprep.subr.bf16.mxu1 %v3141_v0  ;;  %2543 = vmatprep.subr.bf16.mxu0 %v3141_v0  ;;  %v2907_v3 = vld [vmem:[#allocation9 + $0x18] sm:$0xff]   ;;  %v2908_v4 = vld [vmem:[#allocation9 + $0x8] sm:$0xff]   ;;  %vm185_vm2 = vcmask 261120   ;;  %v3352_v19 = vld [vmem:[#allocation9 + $0x10] sm:$0xff]   ;;  %vm132_vm10 = vcmask 516096   ;;  %vm394_vm15 = vcmask 1043456  }
  0x70   :  { %2539 = vmatprep.mubr.msk.bf16.mxu1 %vm3142_vm0, %v3141_v0  ;;  %2547 = vmatprep.mubr.msk.bf16.mxu0 %vm3142_vm0, %v3141_v0  ;;  %v154_v5 = vld [vmem:[#allocation3] sm:$0xff]  ;;  %v155_v6 = vld [vmem:[#allocation6] sm:$0xff]  ;;  %v530_v21 = vld [vmem:[#allocation3 + $0x8] sm:$0xff]  ;;  %vm133_vm11 = vsmask.f32 256 }
  0x71   :  { %2536 = vmatpush3.bf16.msra.mxu1 %v2905_v1  ;;  %2544 = vmatpush3.bf16.msra.mxu0 %v2906_v2  ;;  %v156_v7 = vld [vmem:[#allocation8] sm:$0xff]  ;;  %v532_v22 = vld [vmem:[#allocation6 + $0x8] sm:$0xff]  ;;  %v2913_v25 = vld [vmem:[#allocation9] sm:$0xff]   ;;  %vm138_vm13 = vsmask.f32 7938 }
  0x72   :  { %2537 = vmatprep.subr.bf16.mxu1 %v3141_v0  ;;  %2545 = vmatprep.subr.bf16.mxu0 %v3141_v0  ;;  %v164_v8 = vadd.s32 1, %v156_v7  ;;  %vm157_vm1 = vcmp.eq.s32.totalorder %v155_v6, %v156_v7  ;;  %v291_v9 = vadd.s32 17, %v156_v7  ;;  %v287_v10 = vadd.s32 16, %v156_v7  ;;  %v3355_v20 = vld [vmem:[#allocation9 + $0x18] sm:$0xff]   ;;  %v2914_v27 = vld [vmem:[#allocation9 + $0x8] sm:$0xff]   ;;  %vm3369_vm12 = vmand %vm132_vm10, %vm133_vm11 }
  0x73   :  { %v158_v11 = vsel %vm157_vm1, %v154_v5, 0.0  ;;  %vm534_vm8 = vcmp.eq.s32.totalorder %v532_v22, %v156_v7  ;;  %v135_v31 = vld [vmem:[#allocation2] sm:$0x1]  ;;  %v140_v33 = vld [vmem:[#allocation2 + $0x8] sm:$0x1]  ;;  %vm139_vm14 = vmand %vm132_vm10, %vm138_vm13  ;;  %vm390_vm1 = vcmask 64512  }
  0x74   :  { %vm165_vm3 = vcmp.eq.s32.totalorder %v155_v6, %v164_v8  ;;  %v159_v12 = vpack.c.bf16 %v158_v11, %v158_v11  ;;  %vm292_vm4 = vcmp.eq.s32.totalorder %v155_v6, %v291_v9  ;;  %vm288_vm5 = vcmp.eq.s32.totalorder %v155_v6, %v287_v10  ;;  %v2909_v52 = vld [vmem:[%s3718_s3 + $0x8] sm:$0xff]   ;;  %v2912_v54 = vld [vmem:[%s3718_s3] sm:$0xff]   ;;  %v2918_v60 = vld [vmem:[#allocation11 + $0x18] sm:$0xff]  }
  0x75   :  { %2538 = vmatpush3.bf16.msra.mxu1 %v2907_v3  ;;  %2546 = vmatpush3.bf16.msra.mxu0 %v2908_v4  ;;  %v166_v13 = vsel %vm165_vm3, %v154_v5, 0.0  ;;  %v293_v15 = vsel %vm292_vm4, %v154_v5, 0.0  ;;  %v289_v16 = vsel %vm288_vm5, %v154_v5, 0.0  ;;  %vm542_vm6 = vcmp.eq.s32.totalorder %v532_v22, %v164_v8  ;;  %v2915_v57 = vld [vmem:[#allocation11] sm:$0xff]   ;;  %v2916_v58 = vld [vmem:[#allocation11 + $0x8] sm:$0xff]   ;;  %v2917_v59 = vld [vmem:[#allocation11 + $0x10] sm:$0xff]  }
  0x76   :  { %2551 = vmatprep.subr.bf16.mxu1 %v3141_v0  ;;  %2567 = vmatprep.subr.bf16.mxu0 %v3141_v0  ;;  %v167_v14 = vpack.c.bf16 %v166_v13, %v166_v13  ;;  %v294_v17 = vpack.c.bf16 %v293_v15, %v293_v15  ;;  %v290_v18 = vpack.c.bf16 %v289_v16, %v289_v16  ;;  %v543_v23 = vsel %vm542_vm6, %v530_v21, 0.0 }
  0x77   :  { %v544_v24 = vpack.c.bf16 %v543_v23, %v543_v23  ;;  %vm667_vm7 = vcmp.eq.s32.totalorder %v532_v22, %v291_v9  ;;  %v535_v28 = vsel %vm534_vm8, %v530_v21, 0.0  ;;  %vm663_vm9 = vcmp.eq.s32.totalorder %v532_v22, %v287_v10 }
  0x78   :  { %2548 = vmatmul.mubr.msk.bf16.vlgmr.msra.gmra.mrb[0].mxu0 %vm185_vm2, %v159_v12  ;;  %2540 = vmatmul.mubr.msk.bf16.vlgmr.msra.gmra.mrb[0].mxu1 %vm185_vm2, %v167_v14  ;;  %v668_v26 = vsel %vm667_vm7, %v530_v21, 0.0  ;;  %v536_v29 = vpack.c.bf16 %v535_v28, %v535_v28  ;;  %v664_v30 = vsel %vm663_vm9, %v530_v21, 0.0  ;;  %v136_v34 = vsel %vm3369_vm12, 0, %v135_v31  ;;  %v2958_v21 = vld [vmem:[#allocation12 + $0x8] sm:$0xff]  }
  0x79   :  { %2569 = vmatprep.mubr.msk.bf16.mxu0 %vm3142_vm0, %v3141_v0  ;;  %2552 = vmatpush3.bf16.msra.mxu1 %v2905_v1  ;;  %137 = vst [vmem:[#allocation2] sm:$0x1] %v136_v34  ;;  %v141_v35 = vsel %vm139_vm14, 0, %v140_v33  ;;  %v669_v55 = vpack.c.bf16 %v668_v26, %v668_v26  ;;  %v665_v56 = vpack.c.bf16 %v664_v30, %v664_v30  ;;  %vm144_vm3 = vsmask.f32 1280 }
  0x7a   :  { %2555 = vmatprep.mubr.msk.bf16.mxu1 %vm3142_vm0, %v3141_v0  ;;  %2553 = vmatprep.subr.bf16.mxu1 %v3141_v0  ;;  %142 = vst [vmem:[#allocation2 + $0x8] sm:$0x1] %v141_v35  ;;  %vm149_vm5 = vsmask.f32 7942  ;;  %vm519_vm7 = vcmask 519168  }
  0x7b   :  { %vm497_vm8 = vsmask.f32 4368  ;;  %vm3412_vm9 = vmand %vm519_vm7, %vm138_vm13  ;;  %vm869_vm13 = vsmask.f32 5392 }
  0x7c   :  { %vm3417_vm10 = vmor %vm133_vm11, %vm497_vm8  ;;  %vm988_vm11 = vcmask 523264  }
  0x7d   :  { %2554 = vmatpush3.bf16.msra.mxu1 %v2907_v3  ;;  %v151_v3 = vld [vmem:[#allocation2 + $0x10] sm:$0x2] }
  0x7e   :  { %2559 = vmatprep.subr.bf16.mxu1 %v3141_v0 }
  0x80   :  { %2556 = vmatmul.mubr.msk.bf16.vlgmr.msra.gmra.mrb[4].mxu1 %vm185_vm2, %v294_v17  ;;  %v521_v17 = vld [vmem:[#allocation2] sm:$0xf] }
  0x81   :  { %2560 = vmatpush3.bf16.msra.mxu1 %v2906_v2  ;;  %2563 = vmatprep.mubr.msk.bf16.mxu1 %vm3142_vm0, %v3141_v0  ;;  %v146_v2 = vld [vmem:[#allocation2 + $0x8] sm:$0x2]  ;;  %v526_v22 = vld [vmem:[#allocation2 + $0x8] sm:$0x1] }
  0x82   :  { %2561 = vmatprep.subr.bf16.mxu1 %v3141_v0 }
  0x85   :  { %2562 = vmatpush3.bf16.msra.mxu1 %v2908_v4 }
  0x86   :  { %2579 = vmatprep.subr.bf16.mxu1 %v3141_v0 }
  0x8c   :  { %2564 = vmatmul.mubr.msk.bf16.vlgmr.msra.gmra.mrb[4].mxu1 %vm185_vm2, %v290_v18 }
  0x8d   :  { %2583 = vmatprep.mubr.msk.bf16.mxu1 %vm3142_vm0, %v3141_v0  ;;  %2580 = vmatpush3.bf16.msra.mxu1 %v3352_v19 }
  0x8e   :  { %2581 = vmatprep.subr.bf16.mxu1 %v3141_v0 }
  0x91   :  { %2582 = vmatpush3.bf16.msra.mxu1 %v3355_v20 }
  0x92   :  { %2587 = vmatprep.subr.bf16.mxu1 %v3141_v0 }
  0x94   :  { %2584 = vmatmul.mubr.msk.bf16.vlgmr.msra.gmra.mrb[8].mxu1 %vm185_vm2, %v544_v24 }
  0x95   :  { %2591 = vmatprep.mubr.msk.bf16.mxu1 %vm3142_vm0, %v3141_v0  ;;  %2588 = vmatpush3.bf16.msra.mxu1 %v2913_v25 }
  0x96   :  { %2589 = vmatprep.subr.bf16.mxu1 %v3141_v0 }
  0x99   :  { %2590 = vmatpush3.bf16.msra.mxu1 %v2914_v27 }
  0x9a   :  { %2611 = vmatprep.subr.bf16.mxu1 %v3141_v0 }
  0xa0   :  { %2592 = vmatmul.mubr.msk.bf16.vlgmr.msra.gmra.mrb[8].mxu1 %vm185_vm2, %v536_v29 }
  0xa1   :  { %2613 = vmatprep.mubr.msk.bf16.mxu1 %vm3142_vm0, %v3141_v0 }
 0x14b   :  { %v278_v36 = vpop.f32.mrb[0].mxu0  ;;  %v223_v37 = vpop.f32.mrb[0].mxu1 }
 0x14c   :  { %v2549_v38 = vpop.f32.mrb[1].mxu0  ;;  %v279_v39 = vadd.f32 %v278_v36, %v223_v37  ;;  %v2541_v40 = vpop.f32.mrb[1].mxu1 }
 0x14d   :  { %v281_v41 = vpop.f32.mrb[2].mxu0  ;;  %v226_v42 = vpop.f32.mrb[2].mxu1 }
 0x14e   :  { %v2550_v43 = vpop.f32.mrb[3].mxu0  ;;  %v2542_v44 = vpop.f32.mrb[3].mxu1  ;;  %v286_v49 = vpack.c.bf16 %v279_v39, %v279_v39  ;;  %v2920_v39 = vld [vmem:[%s3718_s3 + $0x8] sm:$0xff]   ;;  %v2921_v41 = vld [vmem:[%s3718_s3] sm:$0xff]  }
 0x14f   :  { %v2922_v42 = vld [vmem:[#allocation11 + $0x20] sm:$0xff]   ;;  %v2923_v43 = vld [vmem:[#allocation11 + $0x28] sm:$0xff]  }
 0x150   :  { %v448_v53 = vsel %vm394_vm15, %v286_v49, 0  ;;  %v2924_v44 = vld [vmem:[#allocation11 + $0x40] sm:$0xff]   ;;  %v2932_v49 = vld [vmem:[#allocation11 + $0x58] sm:$0xff]  }
 0x15f   :  { %v375_v45 = vpop.f32.mrb[4].mxu1 }
 0x160   :  { %v384_v46 = vpack.c.bf16 %v375_v45, %v375_v45  ;;  %v2565_v47 = vpop.f32.mrb[5].mxu1  ;;  %v2925_v45 = vld [vmem:[#allocation11 + $0x30] sm:$0xff]  }
 0x161   :  { %v378_v48 = vpop.f32.mrb[6].mxu1  ;;  %v2928_v47 = vld [vmem:[#allocation11 + $0x48] sm:$0xff]  }
 0x162   :  { %v396_v50 = vsel %vm394_vm15, %v384_v46, 0  ;;  %v2566_v51 = vpop.f32.mrb[7].mxu1  ;;  %v2927_v46 = vld [vmem:[#allocation11 + $0x38] sm:$0xff]   ;;  %v2930_v48 = vld [vmem:[#allocation11 + $0x50] sm:$0xff]  }
 0x163   :  { %2568 = vmatpush3.bf16.msra.mxu0 %v396_v50  ;;  %v1286_v50 = vld [vmem:[%s3720_s5] sm:$0xff]  ;;  %v1288_v51 = vld [vmem:[%s3720_s5 + $0x10] sm:$0xff] }
 0x164   :  { %2573 = vmatprep.subr.bf16.mxu0 %v3141_v0 }
 0x166   :  { %2570 = vmatmul.mubr.msk.bf16.vlgmr.msra.gmra.mrb[4].mxu0 %vm390_vm1, %v2909_v52  ;;  %v3143_v52 = vmov 0  }
 0x167   :  { %2574 = vmatpush3.bf16.msra.mxu0 %v448_v53  ;;  %2575 = vmatprep.mubr.msk.bf16.mxu0 %vm3142_vm0, %v3141_v0  ;;  %v1287_v53 = vld [vmem:[%s3720_s5 + $0x8] sm:$0xff] }
 0x168   :  { %2595 = vmatprep.subr.bf16.mxu0 %v3141_v0  ;;  %2903 = vset.pattern.permute.xlu0 %v3143_v52 }
 0x169   :  { %2904 = vset.pattern.permute.xlu1 %v3143_v52  ;;  %1293 = vperm.xlu0 %2903, %v1286_v50  }
 0x16a   :  { %1303 = vperm.xlu1 %2904, %v1288_v51  }
 0x16d   :  { %1298 = vperm.xlu0 %2903, %v1287_v53  }
 0x172   :  { %2576 = vmatmul.mubr.msk.bf16.vlgmr.msra.gmra.mrb[4].mxu0 %vm390_vm1, %v2912_v54  ;;  %v1289_v54 = vld [vmem:[%s3720_s5 + $0x18] sm:$0xff] }
 0x173   :  { %2596 = vmatpush3.bf16.msra.mxu0 %v3352_v19  ;;  %2599 = vmatprep.mubr.msk.bf16.mxu0 %vm3142_vm0, %v3141_v0  ;;  %v653_v61 = vpop.f32.mrb[8].mxu1 }
 0x174   :  { %2597 = vmatprep.subr.bf16.mxu0 %v3141_v0  ;;  %v2593_v62 = vpop.f32.mrb[9].mxu1  ;;  %v661_v32 = vpack.c.bf16 %v653_v61, %v653_v61  ;;  %1308 = vperm.xlu1 %2904, %v1289_v54  }
 0x175   :  { %v656_v63 = vpop.f32.mrb[10].mxu1 }
 0x176   :  { %v2594_v1 = vpop.f32.mrb[11].mxu1  ;;  %v820_v40 = vsel %vm394_vm15, %v661_v32, 0 }
 0x177   :  { %2598 = vmatpush3.bf16.msra.mxu0 %v3355_v20 }
 0x178   :  { %2603 = vmatprep.subr.bf16.mxu0 %v3141_v0  ;;  %1779 = vperm.xlu1 %2904, %v1286_v50  }
 0x17a   :  { %2600 = vmatmul.mubr.msk.bf16.vlgmr.msra.gmra.mrb[8].mxu0 %vm185_vm2, %v669_v55  ;;  %v1290_v55 = vld [vmem:[%s3720_s5 + $0x20] sm:$0x3] }
 0x17b   :  { %2604 = vmatpush3.bf16.msra.mxu0 %v2913_v25  ;;  %2607 = vmatprep.mubr.msk.bf16.mxu0 %vm3142_vm0, %v3141_v0 }
 0x17c   :  { %2605 = vmatprep.subr.bf16.mxu0 %v3141_v0  ;;  %1313 = vperm.xlu0 %2903, %v1290_v55  }
 0x17d   :  { %1789 = vperm.xlu1 %2904, %v1288_v51  }
 0x17f   :  { %2606 = vmatpush3.bf16.msra.mxu0 %v2914_v27 }
 0x180   :  { %2643 = vmatprep.subr.bf16.mxu0 %v3141_v0  ;;  %1784 = vperm.xlu0 %2903, %v1287_v53  }
 0x184   :  { %1794 = vperm.xlu0 %2903, %v1289_v54  }
 0x186   :  { %2608 = vmatmul.mubr.msk.bf16.vlgmr.msra.gmra.mrb[8].mxu0 %vm185_vm2, %v665_v56  ;;  %vm143_vm2 = vcmask 517121   ;;  %v1776_v56 = vld [vmem:[%s3720_s5 + $0x20] sm:$0x3] }
 0x187   :  { %2651 = vmatprep.mubr.msk.bf16.mxu0 %vm3142_vm0, %v3141_v0  ;;  %2644 = vmatpush3.bf16.msra.mxu0 %v2915_v57  ;;  %vm145_vm4 = vmand %vm143_vm2, %vm144_vm3 }
 0x188   :  { %2645 = vmatprep.subr.bf16.mxu0 %v3141_v0  ;;  %v147_v4 = vsel %vm145_vm4, 0, %v146_v2  ;;  %vm150_vm6 = vmand %vm143_vm2, %vm149_vm5  ;;  %1799 = vperm.xlu1 %2904, %v1776_v56   ;;  %vm940_vm4 = vsmask.f32 7424 }
 0x189   :  { %148 = vst [vmem:[#allocation2 + $0x8] sm:$0x2] %v147_v4  ;;  %v152_v5 = vsel %vm150_vm6, 0, %v151_v3 }
 0x18a   :  { %153 = vst [vmem:[#allocation2 + $0x10] sm:$0x2] %v152_v5 }
 0x18b   :  { %2646 = vmatpush3.bf16.msra.mxu0 %v2916_v58 }
 0x18c   :  { %2647 = vmatprep.subr.bf16.mxu0 %v3141_v0 }
 0x18f   :  { %2648 = vmatpush3.bf16.msra.mxu0 %v2917_v59 }
 0x190   :  { %2649 = vmatprep.subr.bf16.mxu0 %v3141_v0 }
 0x193   :  { %2650 = vmatpush3.bf16.msra.mxu0 %v2918_v60 }
 0x194   :  { %2663 = vmatprep.subr.bf16.mxu0 %v3141_v0 }
 0x245   :  { %v484_v6 = vpop.f32.mrb[4].mxu0 }
 0x246   :  { %v2426_v7 = vpack.c.bf16 %v484_v6, %v484_v6  ;;  %v2577_v8 = vpop.f32.mrb[5].mxu0  ;;  %v895_v6 = vld [vmem:[#allocation2 + $0x8] sm:$0xe] }
 0x247   :  { %v487_v9 = vpop.f32.mrb[6].mxu0 }
 0x248   :  { %v500_v10 = vshrl.u32 %v2426_v7, 16  ;;  %v2427_v11 = vpack.c.bf16 %v487_v9, %v487_v9  ;;  %v2578_v12 = vpop.f32.mrb[7].mxu0  ;;  %v503_v14 = vshll.u32 %v2426_v7, 16 }
 0x24a   :  { %v502_v13 = vrot.slane %v500_v10, 7  ;;  %v508_v15 = vshrl.u32 %v2427_v11, 16  ;;  %v511_v20 = vshll.u32 %v2427_v11, 16 }
 0x24c   :  { %v505_v18 = vor.u32 %v503_v14, %v502_v13  ;;  %v510_v19 = vrot.slane %v508_v15, 7  ;;  %v506_v23 = vrot.slane %v502_v13, 4  ;;  %v901_v14 = vld [vmem:[#allocation2 + $0x10] sm:$0x3] }
 0x24e   :  { %v522_v24 = vsel %vm3412_vm9, %v505_v18, %v521_v17  ;;  %v513_v25 = vor.u32 %v511_v20, %v510_v19  ;;  %v515_v26 = vrot.slane %v510_v19, 4 }
 0x24f   :  { %523 = vst [vmem:[#allocation2] sm:$0xf] %v522_v24 }
 0x250   :  { %v514_v27 = vsel %vm3417_vm10, %v506_v23, %v513_v25  ;;  %v527_v28 = vsel %vm3369_vm12, %v515_v26, %v526_v22  ;;  %vm893_vm12 = vcmask 519169  }
 0x251   :  { %525 = vst.msk [vmem:[#allocation2 + $0x4] sm:$0xf] %vm519_vm7, %v514_v27  ;;  %528 = vst [vmem:[#allocation2 + $0x8] sm:$0x1] %v527_v28 }
 0x252   :  { %vm894_vm14 = vmand %vm893_vm12, %vm149_vm5 }
 0x256   :  { %v3428_v29 = vld [vmem:[#allocation2] sm:$0xf] }
 0x257   :  { %v1144_v32 = vld [vmem:[#allocation2] sm:$0xe] }
 0x258   :  { %v3430_v30 = vld [vmem:[#allocation2 + $0x4] sm:$0xf] }
 0x259   :  { %v750_v31 = vpop.f32.mrb[8].mxu0  ;;  %v3434_v33 = vcombine.low %v3428_v29, %v3430_v30 }
 0x25a   :  { %v758_v34 = vpack.c.bf16 %v750_v31, %v750_v31  ;;  %v2609_v35 = vpop.f32.mrb[9].mxu0 }
 0x25b   :  { %v753_v36 = vpop.f32.mrb[10].mxu0  ;;  %2652 = vmatmul.mubr.msk.bf16.vlgmr.msra.gmra.mrb[12].mxu0 %vm988_vm11, %v3434_v33  ;;  %v944_v19 = vshll.u32 %v3434_v33, 16  ;;  %v942_v23 = vshrl.u32 %v3434_v33, 16 }
 0x25c   :  { %v768_v37 = vsel %vm394_vm15, %v758_v34, 0  ;;  %v2610_v38 = vpop.f32.mrb[11].mxu0  ;;  %2655 = vmatprep.mubr.msk.bf16.mxu0 %vm3142_vm0, %v3141_v0  ;;  %2664 = vmatpush3.bf16.msra.mxu0 %v2924_v44  ;;  %vm899_vm15 = vcmask 517120  }
 0x25d   :  { %2612 = vmatpush3.bf16.msra.mxu1 %v768_v37  ;;  %2665 = vmatprep.subr.bf16.mxu0 %v3141_v0  ;;  %vm3485_vm2 = vmand %vm899_vm15, %vm144_vm3  ;;  %v946_v22 = vrot.slane %v944_v19, 1  ;;  %v2334_v37 = vcombine.low %v1144_v32, %v3430_v30 }
 0x25e   :  { %2617 = vmatprep.subr.bf16.mxu1 %v3141_v0 }
 0x25f   :  { %v947_v26 = vor.u32 %v946_v22, %v942_v23 }
 0x260   :  { %2614 = vmatmul.mubr.msk.bf16.vlgmr.msra.gmra.mrb[12].mxu1 %vm390_vm1, %v2920_v39  ;;  %2666 = vmatpush3.bf16.msra.mxu0 %v2928_v47  ;;  %v2935_v47 = vld [vmem:[%s3724_s9 + $0x30] sm:$0xff]  }
 0x261   :  { %2618 = vmatpush3.bf16.msra.mxu1 %v820_v40  ;;  %2619 = vmatprep.mubr.msk.bf16.mxu1 %vm3142_vm0, %v3141_v0  ;;  %v1158_v40 = vrot.slane %v2334_v37, 1 }
 0x262   :  { %2623 = vmatprep.subr.bf16.mxu1 %v3141_v0  ;;  %2667 = vmatprep.subr.bf16.mxu0 %v3141_v0 }
 0x264   :  { %2668 = vmatpush3.bf16.msra.mxu0 %v2930_v48  ;;  %v2936_v48 = vld [vmem:[%s3724_s9 + $0x38] sm:$0xff]  }
 0x265   :  { %2669 = vmatprep.subr.bf16.mxu0 %v3141_v0 }
 0x268   :  { %2670 = vmatpush3.bf16.msra.mxu0 %v2932_v49 }
 0x269   :  { %2743 = vmatprep.subr.bf16.mxu0 %v3141_v0 }
 0x26c   :  { %2620 = vmatmul.mubr.msk.bf16.vlgmr.msra.gmra.mrb[12].mxu1 %vm390_vm1, %v2921_v41  ;;  %vm870_vm1 = vmor %vm144_vm3, %vm869_vm13  ;;  %vm1157_vm3 = vcmask 1046528  }
 0x26d   :  { %2631 = vmatprep.mubr.msk.bf16.mxu1 %vm3142_vm0, %v3141_v0  ;;  %2624 = vmatpush3.bf16.msra.mxu1 %v2922_v42 }
 0x26e   :  { %2625 = vmatprep.subr.bf16.mxu1 %v3141_v0 }
 0x271   :  { %2626 = vmatpush3.bf16.msra.mxu1 %v2923_v43 }
 0x272   :  { %2627 = vmatprep.subr.bf16.mxu1 %v3141_v0 }
 0x275   :  { %2628 = vmatpush3.bf16.msra.mxu1 %v2925_v45  ;;  %v2933_v45 = vld [vmem:[%s3724_s9 + $0x20] sm:$0xff]  }
 0x276   :  { %2629 = vmatprep.subr.bf16.mxu1 %v3141_v0 }
 0x279   :  { %2630 = vmatpush3.bf16.msra.mxu1 %v2927_v46  ;;  %v2934_v46 = vld [vmem:[%s3724_s9 + $0x28] sm:$0xff]  }
 0x27a   :  { %2683 = vmatprep.subr.bf16.mxu1 %v3141_v0 }
 0x33f   :  { %v856_v57 = vpop.f32.mrb[12].mxu1 }
 0x340   :  { %v2428_v58 = vpack.c.bf16 %v856_v57, %v856_v57  ;;  %v2621_v59 = vpop.f32.mrb[13].mxu1 }
 0x341   :  { %v859_v60 = vpop.f32.mrb[14].mxu1 }
 0x342   :  { %v872_v61 = vshrl.u32 %v2428_v58, 16  ;;  %v875_v62 = vshll.u32 %v2428_v58, 16  ;;  %v2429_v63 = vpack.c.bf16 %v859_v60, %v859_v60  ;;  %v2622_v1 = vpop.f32.mrb[15].mxu1  ;;  %v2342_v58 = vld [vmem:[%s3722_s7] ss:$0 sm:$0xff] }
 0x344   :  { %v874_v2 = vrot.slane %v872_v61, 6  ;;  %v877_v3 = vrot.slane %v875_v62, 7  ;;  %v881_v4 = vshrl.u32 %v2429_v63, 16  ;;  %v884_v5 = vshll.u32 %v2429_v63, 16  ;;  %v2343_v61 = vld [vmem:[%s3723_s8] ss:$0 sm:$0xff] }
 0x346   :  { %v878_v7 = vor.u32 %v877_v3, %v874_v2  ;;  %v883_v8 = vrot.slane %v881_v4, 6  ;;  %v886_v9 = vrot.slane %v884_v5, 7  ;;  %v1294_v3 = vpop.permute.xlu0 %1293 }
 0x348   :  { %v879_v10 = vrot.slane %v878_v7, 4  ;;  %v896_v11 = vsel %vm894_vm14, %v878_v7, %v895_v6  ;;  %v887_v12 = vor.u32 %v886_v9, %v883_v8 }
 0x349   :  { %897 = vst [vmem:[#allocation2 + $0x8] sm:$0xe] %v896_v11 }
 0x34a   :  { %v888_v15 = vsel %vm870_vm1, %v879_v10, %v887_v12  ;;  %v889_v17 = vrot.slane %v887_v12, 4  ;;  %v1299_v19 = vpop.permute.xlu0 %1298 }
 0x34b   :  { %898 = vst.msk [vmem:[#allocation2 + $0xc] sm:$0xf] %vm519_vm7, %v888_v15 }
 0x34c   :  { %v902_v18 = vsel %vm3485_vm2, %v889_v17, %v901_v14 }
 0x34d   :  { %903 = vst [vmem:[#allocation2 + $0x10] sm:$0x3] %v902_v18 }
 0x352   :  { %v2926_v20 = vld [vmem:[#allocation2 + $0x8] sm:$0xff]  }
 0x353   :  { %2656 = vmatmul.mubr.msk.bf16.gmra.mrb[16].mxu0 %vm988_vm11, %v2926_v20  ;;  %v949_v24 = vshll.u32 %v2926_v20, 16  ;;  %v953_v35 = vshrl.u32 %v2926_v20, 16  ;;  %v1159_v38 = vrot.slane %v2926_v20, 1 }
 0x354   :  { %2659 = vmatprep.mubr.msk.bf16.mxu0 %vm3142_vm0, %v3141_v0  ;;  %v2931_v25 = vld [vmem:[#allocation2 + $0x10] ss:$0 sps:$4 sm:$0x33]  }
 0x355   :  { %v951_v27 = vrot.slane %v949_v24, 1  ;;  %v957_v31 = vshll.u32 %v2931_v25, 16  ;;  %v2929_v34 = vld [vmem:[#allocation2 + $0x10] ss:$0 sps:$4 sm:$0x11]   ;;  %v1160_v41 = vsel %vm1157_vm3, %v1158_v40, %v1159_v38  ;;  %v961_v42 = vshrl.u32 %v2931_v25, 16 }
 0x356   :  { %v1161_v30 = vrot.slane %v2931_v25, 1 }
 0x357   :  { %v952_v28 = vsel %vm940_vm4, %v947_v26, %v951_v27  ;;  %v955_v33 = vor.u32 %v953_v35, %v951_v27  ;;  %v959_v36 = vrot.slane %v957_v31, 1 }
 0x358   :  { %2632 = vmatmul.mubr.msk.bf16.vlgmr.msra.gmra.mrb[16].mxu1 %vm988_vm11, %v952_v28  ;;  %v1162_v44 = vsel %vm1157_vm3, %v1159_v38, %v1161_v30  ;;  %v1304_v28 = vpop.permute.xlu1 %1303 }
 0x359   :  { %2635 = vmatprep.mubr.msk.bf16.mxu1 %vm3142_vm0, %v3141_v0  ;;  %v960_v39 = vsel %vm940_vm4, %v955_v33, %v959_v36  ;;  %v963_v43 = vor.u32 %v961_v42, %v959_v36  ;;  %2684 = vmatpush3.bf16.msra.mxu1 %v2933_v45 }
 0x35a   :  { %2685 = vmatprep.subr.bf16.mxu1 %v3141_v0 }
 0x35b   :  { %2660 = vmatmul.mubr.msk.bf16.gmra.mrb[20].mxu0 %vm988_vm11, %v2929_v34 }
 0x35c   :  { %2671 = vmatprep.mubr.msk.bf16.mxu0 %vm3142_vm0, %v3141_v0 }
 0x35d   :  { %2686 = vmatpush3.bf16.msra.mxu1 %v2934_v46 }
 0x35e   :  { %2687 = vmatprep.subr.bf16.mxu1 %v3141_v0 }
 0x360   :  { %2636 = vmatmul.mubr.msk.bf16.gmra.mrb[20].mxu1 %vm988_vm11, %v960_v39 }
 0x361   :  { %2639 = vmatprep.mubr.msk.bf16.mxu1 %vm3142_vm0, %v3141_v0  ;;  %2688 = vmatpush3.bf16.msra.mxu1 %v2935_v47 }
 0x362   :  { %2689 = vmatprep.subr.bf16.mxu1 %v3141_v0 }
 0x363   :  { %2672 = vmatmul.mubr.msk.bf16.vlgmr.msra.gmra.mrb[12].mxu0 %vm988_vm11, %v1160_v41 }
 0x364   :  { %2675 = vmatprep.mubr.msk.bf16.mxu0 %vm3142_vm0, %v3141_v0 }
 0x365   :  { %2690 = vmatpush3.bf16.msra.mxu1 %v2936_v48 }
 0x366   :  { %2703 = vmatprep.subr.bf16.mxu1 %v3141_v0 }
 0x368   :  { %2640 = vmatmul.mubr.msk.bf16.gmra.mrb[24].mxu1 %vm988_vm11, %v963_v43 }
 0x369   :  { %2691 = vmatprep.mubr.msk.bf16.mxu1 %vm3142_vm0, %v3141_v0 }
 0x36b   :  { %2676 = vmatmul.mubr.msk.bf16.gmra.mrb[16].mxu0 %vm988_vm11, %v1162_v44 }
 0x36c   :  { %2679 = vmatprep.mubr.msk.bf16.mxu0 %vm3142_vm0, %v3141_v0 }
 0x373   :  { %2680 = vmatmul.mubr.msk.bf16.gmra.mrb[20].mxu0 %vm988_vm11, %v1161_v30 }
 0x374   :  { %2751 = vmatprep.mubr.msk.bf16.mxu0 %vm3142_vm0, %v3141_v0 }
 0x42b   :  { %v1032_v49 = vpop.f32.mrb[16].mxu1 }
 0x42c   :  { %v2633_v50 = vpop.f32.mrb[17].mxu1 }
 0x42d   :  { %v1035_v51 = vpop.f32.mrb[18].mxu1  ;;  %v1309_v50 = vpop.permute.xlu1 %1308 }
 0x42e   :  { %v2634_v52 = vpop.f32.mrb[19].mxu1 }
 0x433   :  { %v1040_v53 = vpop.f32.mrb[20].mxu1 }
 0x434   :  { %v2637_v54 = vpop.f32.mrb[21].mxu1 }
 0x435   :  { %v1043_v55 = vpop.f32.mrb[22].mxu1 }
 0x436   :  { %v2638_v56 = vpop.f32.mrb[23].mxu1  ;;  %v1230_v57 = vpop.f32.mrb[12].mxu0 }
 0x437   :  { %v2804_v59 = vadd.f32 %v1230_v57, %v1032_v49  ;;  %v2673_v60 = vpop.f32.mrb[13].mxu0 }
 0x438   :  { %v1233_v62 = vpop.f32.mrb[14].mxu0 }
 0x439   :  { %v1264_v63 = vmul.f32 %v2804_v59, %v2342_v58  ;;  %v2805_v1 = vadd.f32 %v1233_v62, %v1035_v51  ;;  %v2674_v2 = vpop.f32.mrb[15].mxu0 }
 0x43b   :  { %v1276_v4 = vadd.f32 %v2343_v61, %v1264_v63  ;;  %v1265_v5 = vmul.f32 %v2805_v1, %v2342_v58  ;;  %v1048_v6 = vpop.f32.mrb[24].mxu1 }
 0x43c   :  { %v2641_v7 = vpop.f32.mrb[25].mxu1 }
 0x43d   :  { %v1281_v8 = vmax.f32 %v1276_v4, 0.0  ;;  %v1277_v9 = vadd.f32 %v2343_v61, %v1265_v5  ;;  %v1051_v10 = vpop.f32.mrb[26].mxu1 }
 0x43e   :  { %v2642_v11 = vpop.f32.mrb[27].mxu1  ;;  %v1238_v12 = vpop.f32.mrb[16].mxu0 }
 0x43f   :  { %v1316_v14 = vmul.f32 %v1294_v3, %v1281_v8  ;;  %v1282_v15 = vmax.f32 %v1277_v9, 0.0  ;;  %v2806_v17 = vadd.f32 %v1238_v12, %v1040_v53  ;;  %v2677_v18 = vpop.f32.mrb[17].mxu0  ;;  %v1314_v3 = vpop.permute.xlu0 %1313 }
 0x440   :  { %v1241_v20 = vpop.f32.mrb[18].mxu0 }
 0x441   :  { %v2430_v22 = vpack.c.bf16 %v1316_v14, %v1316_v14  ;;  %v1317_v23 = vmul.f32 %v1299_v19, %v1282_v15  ;;  %v1266_v24 = vmul.f32 %v2806_v17, %v2342_v58  ;;  %v2807_v25 = vadd.f32 %v1241_v20, %v1043_v55  ;;  %v2678_v26 = vpop.f32.mrb[19].mxu0 }
 0x443   :  { %v1338_v27 = vshrl.u32 %v2430_v22, 16  ;;  %v2431_v31 = vpack.c.bf16 %v1317_v23, %v1317_v23  ;;  %v1278_v34 = vadd.f32 %v2343_v61, %v1266_v24  ;;  %v1267_v35 = vmul.f32 %v2807_v25, %v2342_v58  ;;  %v1390_v23 = vld [vmem:[#allocation2 + $0x10] sm:$0x3] }
 0x444   :  { %v1341_v36 = vshll.u32 %v2430_v22, 16 }
 0x445   :  { %v1340_v33 = vrot.slane %v1338_v27, 7  ;;  %v1346_v32 = vshrl.u32 %v2431_v31, 16  ;;  %v1283_v37 = vmax.f32 %v1278_v34, 0.0  ;;  %v1279_v38 = vadd.f32 %v2343_v61, %v1267_v35  ;;  %v2939_v35 = vld [vmem:[%s3724_s9] sm:$0xff]  }
 0x446   :  { %v1246_v39 = vpop.f32.mrb[20].mxu0  ;;  %v1349_v42 = vshll.u32 %v2431_v31, 16 }
 0x447   :  { %v1343_v40 = vor.u32 %v1341_v36, %v1340_v33  ;;  %v1348_v41 = vrot.slane %v1346_v32, 7  ;;  %v1318_v43 = vmul.f32 %v1304_v28, %v1283_v37  ;;  %v2681_v30 = vpop.f32.mrb[21].mxu0  ;;  %v1284_v44 = vmax.f32 %v1279_v38, 0.0  ;;  %v2941_v32 = vld [vmem:[%s3724_s9 + $0x8] sm:$0xff]  }
 0x448   :  { %v2808_v45 = vadd.f32 %v1246_v39, %v1048_v6  ;;  %v1249_v46 = vpop.f32.mrb[22].mxu0  ;;  %v1344_v47 = vrot.slane %v1340_v33, 4 }
 0x449   :  { %v1385_v48 = vsel %vm3412_vm9, %v1343_v40, %v3428_v29  ;;  %v1351_v49 = vor.u32 %v1349_v42, %v1348_v41  ;;  %v2432_v51 = vpack.c.bf16 %v1318_v43, %v1318_v43  ;;  %v2682_v52 = vpop.f32.mrb[23].mxu0  ;;  %v1319_v53 = vmul.f32 %v1309_v50, %v1284_v44  ;;  %v2943_v43 = vld [vmem:[%s3724_s9 + $0x18] sm:$0xff]   ;;  %v2945_v46 = vld [vmem:[%s3724_s9 + $0x48] sm:$0xff]  }
 0x44a   :  { %1386 = vst [vmem:[#allocation2] sm:$0xf] %v1385_v48  ;;  %v1268_v54 = vmul.f32 %v2808_v45, %v2342_v58  ;;  %v1353_v29 = vrot.slane %v1348_v41, 4  ;;  %v2942_v41 = vld [vmem:[%s3724_s9 + $0x10] sm:$0xff]   ;;  %v2944_v45 = vld [vmem:[%s3724_s9 + $0x40] sm:$0xff]   ;;  %v2948_v48 = vld [vmem:[%s3724_s9 + $0x58] sm:$0xff]  }
 0x44b   :  { %v1352_v55 = vsel %vm3417_vm10, %v1344_v47, %v1351_v49  ;;  %v1355_v56 = vshrl.u32 %v2432_v51, 16  ;;  %v2433_v57 = vpack.c.bf16 %v1319_v53, %v1319_v53  ;;  %v1358_v62 = vshll.u32 %v2432_v51, 16  ;;  %v2947_v47 = vld [vmem:[%s3724_s9 + $0x50] sm:$0xff]  }
 0x44c   :  { %1387 = vst.msk [vmem:[#allocation2 + $0x4] sm:$0xf] %vm519_vm7, %v1352_v55  ;;  %v1280_v59 = vadd.f32 %v2343_v61, %v1268_v54 }
 0x44d   :  { %v1357_v60 = vrot.slane %v1355_v56, 7  ;;  %v1364_v63 = vshrl.u32 %v2433_v57, 16  ;;  %v1367_v5 = vshll.u32 %v2433_v57, 16  ;;  %v2950_v57 = vld [vmem:[#allocation12 + $0x20] sm:$0xff]  }
 0x44e   :  { %v1285_v1 = vmax.f32 %v1280_v59, 0.0  ;;  %2744 = vmatpush3.bf16.msra.mxu0 %v2950_v57  ;;  %v2951_v59 = vld [vmem:[#allocation12 + $0x28] sm:$0xff]  }
 0x44f   :  { %v1360_v2 = vor.u32 %v1358_v62, %v1357_v60  ;;  %v1366_v4 = vrot.slane %v1364_v63, 7  ;;  %v1362_v7 = vrot.slane %v1357_v60, 4  ;;  %2745 = vmatprep.subr.bf16.mxu0 %v3141_v0  ;;  %v2952_v60 = vld [vmem:[#allocation12 + $0x30] sm:$0xff]   ;;  %v2953_v62 = vld [vmem:[#allocation12 + $0x38] sm:$0xff]   ;;  %v2391_v63 = vld [vmem:[%s3725_s10] ss:$0 sm:$0xff] }
 0x450   :  { %v1320_v6 = vmul.f32 %v1314_v3, %v1285_v1 }
 0x451   :  { %v1361_v58 = vsel %vm3417_vm10, %v1353_v29, %v1360_v2  ;;  %v1369_v8 = vor.u32 %v1367_v5, %v1366_v4  ;;  %v3554_v10 = vld [vmem:[#allocation2] sm:$0xf]  ;;  %v1371_v18 = vrot.slane %v1366_v4, 4 }
 0x452   :  { %1388 = vst.msk [vmem:[#allocation2 + $0x8] sm:$0xf] %vm519_vm7, %v1361_v58  ;;  %v2434_v9 = vpack.c.bf16 %v1320_v6, %v1320_v6  ;;  %v1631_v50 = vld [vmem:[#allocation2] sm:$0xe]  ;;  %2746 = vmatpush3.bf16.msra.mxu0 %v2951_v59  ;;  %v2392_v29 = vld [vmem:[%s3726_s11] ss:$0 sm:$0xff] }
 0x453   :  { %v3556_v61 = vld [vmem:[#allocation2 + $0x4] sm:$0xf]  ;;  %v1370_v11 = vsel %vm3417_vm10, %v1362_v7, %v1369_v8  ;;  %2747 = vmatprep.subr.bf16.mxu0 %v3141_v0 }
 0x454   :  { %v1373_v12 = vshrl.u32 %v2434_v9, 16  ;;  %v2357_v14 = vcombine.low %v3554_v10, %v3556_v61  ;;  %1389 = vst.msk [vmem:[#allocation2 + $0xc] sm:$0xf] %vm519_vm7, %v1370_v11  ;;  %v1376_v17 = vshll.u32 %v2434_v9, 16  ;;  %v2383_v51 = vcombine.low %v1631_v50, %v3556_v61  ;;  %v1780_v9 = vpop.permute.xlu1 %1779 }
 0x456   :  { %v1375_v15 = vrot.slane %v1373_v12, 7  ;;  %v1432_v20 = vshll.u32 %v2357_v14, 16  ;;  %v1430_v27 = vshrl.u32 %v2357_v14, 16  ;;  %v1644_v53 = vrot.slane %v2383_v51, 1  ;;  %2748 = vmatpush3.bf16.msra.mxu0 %v2952_v60  ;;  %v1785_v12 = vpop.permute.xlu0 %1784 }
 0x457   :  { %2749 = vmatprep.subr.bf16.mxu0 %v3141_v0 }
 0x458   :  { %v1378_v19 = vor.u32 %v1376_v17, %v1375_v15  ;;  %v1434_v26 = vrot.slane %v1432_v20, 1 }
 0x45a   :  { %v1379_v22 = vsel %vm3417_vm10, %v1371_v18, %v1378_v19  ;;  %v1435_v31 = vor.u32 %v1434_v26, %v1430_v27  ;;  %2750 = vmatpush3.bf16.msra.mxu0 %v2953_v62 }
 0x45b   :  { %v1391_v24 = vsel %vm3485_vm2, %v1379_v22, %v1390_v23  ;;  %v2938_v25 = vld [vmem:[#allocation2 + $0x8] sm:$0xff]   ;;  %2763 = vmatprep.subr.bf16.mxu0 %v3141_v0 }
 0x45c   :  { %1392 = vst [vmem:[#allocation2 + $0x10] sm:$0x3] %v1391_v24  ;;  %v1437_v28 = vshll.u32 %v2938_v25, 16  ;;  %v1441_v37 = vshrl.u32 %v2938_v25, 16  ;;  %v1645_v52 = vrot.slane %v2938_v25, 1 }
 0x45e   :  { %v1439_v34 = vrot.slane %v1437_v28, 1  ;;  %v1646_v54 = vsel %vm1157_vm3, %v1644_v53, %v1645_v52 }
 0x460   :  { %v1440_v33 = vsel %vm940_vm4, %v1435_v31, %v1439_v34  ;;  %v1443_v39 = vor.u32 %v1441_v37, %v1439_v34 }
 0x461   :  { %2692 = vmatmul.mubr.msk.bf16.vlgmr.msra.gmra.mrb[28].mxu1 %vm988_vm11, %v1440_v33 }
 0x462   :  { %2704 = vmatpush3.bf16.msra.mxu1 %v2939_v35  ;;  %2695 = vmatprep.mubr.msk.bf16.mxu1 %vm3142_vm0, %v3141_v0  ;;  %v1790_v35 = vpop.permute.xlu1 %1789 }
 0x463   :  { %v2940_v36 = vld [vmem:[#allocation2 + $0x10] ss:$0 sps:$4 sm:$0x33]   ;;  %2705 = vmatprep.subr.bf16.mxu1 %v3141_v0 }
 0x464   :  { %v1445_v38 = vshll.u32 %v2940_v36, 16  ;;  %v1449_v30 = vshrl.u32 %v2940_v36, 16  ;;  %v2946_v49 = vld [vmem:[#allocation2 + $0x10] ss:$0 sps:$4 sm:$0x11]   ;;  %v1647_v55 = vrot.slane %v2940_v36, 1 }
 0x466   :  { %v1447_v40 = vrot.slane %v1445_v38, 1  ;;  %2706 = vmatpush3.bf16.msra.mxu1 %v2941_v32  ;;  %v1648_v56 = vsel %vm1157_vm3, %v1645_v52, %v1647_v55 }
 0x467   :  { %2707 = vmatprep.subr.bf16.mxu1 %v3141_v0 }
 0x468   :  { %v1448_v42 = vsel %vm940_vm4, %v1443_v39, %v1447_v40  ;;  %v1451_v44 = vor.u32 %v1449_v30, %v1447_v40 }
 0x469   :  { %2696 = vmatmul.mubr.msk.bf16.gmra.mrb[32].mxu1 %vm988_vm11, %v1448_v42 }
 0x46a   :  { %2699 = vmatprep.mubr.msk.bf16.mxu1 %vm3142_vm0, %v3141_v0  ;;  %2708 = vmatpush3.bf16.msra.mxu1 %v2942_v41  ;;  %v1795_v41 = vpop.permute.xlu0 %1794 }
 0x46b   :  { %2709 = vmatprep.subr.bf16.mxu1 %v3141_v0 }
 0x46e   :  { %2710 = vmatpush3.bf16.msra.mxu1 %v2943_v43 }
 0x46f   :  { %2723 = vmatprep.subr.bf16.mxu1 %v3141_v0 }
 0x471   :  { %2700 = vmatmul.mubr.msk.bf16.gmra.mrb[36].mxu1 %vm988_vm11, %v1451_v44 }
 0x472   :  { %2711 = vmatprep.mubr.msk.bf16.mxu1 %vm3142_vm0, %v3141_v0 }
 0x479   :  { %2712 = vmatmul.mubr.msk.bf16.vlgmr.msra.gmra.mrb[28].mxu1 %vm988_vm11, %v2357_v14 }
 0x47a   :  { %2724 = vmatpush3.bf16.msra.mxu1 %v2944_v45  ;;  %2715 = vmatprep.mubr.msk.bf16.mxu1 %vm3142_vm0, %v3141_v0 }
 0x47b   :  { %2725 = vmatprep.subr.bf16.mxu1 %v3141_v0 }
 0x47e   :  { %2726 = vmatpush3.bf16.msra.mxu1 %v2945_v46 }
 0x47f   :  { %2727 = vmatprep.subr.bf16.mxu1 %v3141_v0 }
 0x481   :  { %2716 = vmatmul.mubr.msk.bf16.gmra.mrb[32].mxu1 %vm988_vm11, %v2938_v25 }
 0x482   :  { %2719 = vmatprep.mubr.msk.bf16.mxu1 %vm3142_vm0, %v3141_v0  ;;  %2728 = vmatpush3.bf16.msra.mxu1 %v2947_v47 }
 0x483   :  { %2729 = vmatprep.subr.bf16.mxu1 %v3141_v0 }
 0x486   :  { %2730 = vmatpush3.bf16.msra.mxu1 %v2948_v48 }
 0x489   :  { %2720 = vmatmul.mubr.msk.bf16.gmra.mrb[36].mxu1 %vm988_vm11, %v2946_v49 }
 0x48a   :  { %2731 = vmatprep.mubr.msk.bf16.mxu1 %vm3142_vm0, %v3141_v0 }
 0x491   :  { %2732 = vmatmul.mubr.msk.bf16.vlgmr.msra.gmra.mrb[28].mxu1 %vm988_vm11, %v1646_v54 }
 0x492   :  { %2735 = vmatprep.mubr.msk.bf16.mxu1 %vm3142_vm0, %v3141_v0 }
 0x499   :  { %2736 = vmatmul.mubr.msk.bf16.gmra.mrb[32].mxu1 %vm988_vm11, %v1648_v56  ;;  %v1800_v56 = vpop.permute.xlu1 %1799 }
 0x49a   :  { %2739 = vmatprep.mubr.msk.bf16.mxu1 %vm3142_vm0, %v3141_v0 }
 0x4a1   :  { %2740 = vmatmul.mubr.msk.bf16.gmra.mrb[36].mxu1 %vm988_vm11, %v1647_v55 }
 0x564   :  { %v1716_v1 = vpop.f32.mrb[28].mxu1 }
 0x565   :  { %v1750_v2 = vmul.f32 %v2391_v63, %v1716_v1  ;;  %v2733_v3 = vpop.f32.mrb[29].mxu1 }
 0x566   :  { %v1719_v4 = vpop.f32.mrb[30].mxu1 }
 0x567   :  { %v1762_v5 = vadd.f32 %v2392_v29, %v1750_v2  ;;  %v1751_v6 = vmul.f32 %v2391_v63, %v1719_v4  ;;  %v2734_v58 = vpop.f32.mrb[31].mxu1 }
 0x569   :  { %v1767_v7 = vmax.f32 %v1762_v5, 0.0  ;;  %v1763_v8 = vadd.f32 %v2392_v29, %v1751_v6 }
 0x56b   :  { %v1802_v61 = vmul.f32 %v1780_v9, %v1767_v7  ;;  %v1768_v11 = vmax.f32 %v1763_v8, 0.0 }
 0x56c   :  { %v1724_v14 = vpop.f32.mrb[32].mxu1 }
 0x56d   :  { %v2435_v15 = vpack.c.bf16 %v1802_v61, %v1802_v61  ;;  %v1803_v17 = vmul.f32 %v1785_v12, %v1768_v11  ;;  %v1752_v18 = vmul.f32 %v2391_v63, %v1724_v14  ;;  %v2737_v19 = vpop.f32.mrb[33].mxu1 }
 0x56e   :  { %v1727_v20 = vpop.f32.mrb[34].mxu1 }
 0x56f   :  { %v1824_v22 = vshrl.u32 %v2435_v15, 16  ;;  %v2436_v23 = vpack.c.bf16 %v1803_v17, %v1803_v17  ;;  %v1764_v24 = vadd.f32 %v2392_v29, %v1752_v18  ;;  %v2738_v25 = vpop.f32.mrb[35].mxu1  ;;  %v1753_v26 = vmul.f32 %v2391_v63, %v1727_v20 }
 0x570   :  { %v1827_v28 = vshll.u32 %v2435_v15, 16  ;;  %v1876_v15 = vld [vmem:[#allocation2 + $0x10] sm:$0x3]  ;;  %v2956_v25 = vld [vmem:[#allocation12] sm:$0xff]  }
 0x571   :  { %v1826_v27 = vrot.slane %v1824_v22, 7  ;;  %v1832_v31 = vshrl.u32 %v2436_v23, 16  ;;  %v1769_v34 = vmax.f32 %v1764_v24, 0.0  ;;  %v1765_v33 = vadd.f32 %v2392_v29, %v1753_v26 }
 0x572   :  { %v1835_v37 = vshll.u32 %v2436_v23, 16 }
 0x573   :  { %v1829_v36 = vor.u32 %v1827_v28, %v1826_v27  ;;  %v1834_v32 = vrot.slane %v1832_v31, 7  ;;  %v1804_v38 = vmul.f32 %v1790_v35, %v1769_v34  ;;  %v1770_v39 = vmax.f32 %v1765_v33, 0.0  ;;  %v2959_v35 = vld [vmem:[#allocation12 + $0x10] sm:$0xff]  }
 0x574   :  { %v1732_v40 = vpop.f32.mrb[36].mxu1  ;;  %v1830_v42 = vrot.slane %v1826_v27, 4 }
 0x575   :  { %v1871_v43 = vsel %vm3412_vm9, %v1829_v36, %v3554_v10  ;;  %v1837_v30 = vor.u32 %v1835_v37, %v1834_v32  ;;  %v2437_v44 = vpack.c.bf16 %v1804_v38, %v1804_v38  ;;  %v2741_v45 = vpop.f32.mrb[37].mxu1  ;;  %v1805_v46 = vmul.f32 %v1795_v41, %v1770_v39  ;;  %v2960_v36 = vld [vmem:[#allocation12 + $0x18] sm:$0xff]   ;;  %v2961_v38 = vld [vmem:[#allocation12 + $0x40] sm:$0xff]   ;;  %v2962_v39 = vld [vmem:[#allocation12 + $0x48] sm:$0xff]  }
 0x576   :  { %1872 = vst [vmem:[#allocation2] sm:$0xf] %v1871_v43  ;;  %v1754_v47 = vmul.f32 %v2391_v63, %v1732_v40  ;;  %v1735_v48 = vpop.f32.mrb[38].mxu1  ;;  %v1839_v57 = vrot.slane %v1834_v32, 4  ;;  %v2964_v40 = vld [vmem:[#allocation12 + $0x50] sm:$0xff]   ;;  %v2965_v41 = vld [vmem:[#allocation12 + $0x58] sm:$0xff]  }
 0x577   :  { %v1838_v49 = vsel %vm3417_vm10, %v1830_v42, %v1837_v30  ;;  %v1841_v50 = vshrl.u32 %v2437_v44, 16  ;;  %v2742_v51 = vpop.f32.mrb[39].mxu1  ;;  %v2438_v52 = vpack.c.bf16 %v1805_v46, %v1805_v46  ;;  %v1844_v55 = vshll.u32 %v2437_v44, 16 }
 0x578   :  { %1873 = vst.msk [vmem:[#allocation2 + $0x4] sm:$0xf] %vm519_vm7, %v1838_v49  ;;  %v1766_v53 = vadd.f32 %v2392_v29, %v1754_v47  ;;  %v2424_v49 = vld [vmem:[%s3728_s13] ss:$0 sm:$0xff]  ;;  %s3144_s13 = smov [#allocation14]  }
 0x579   :  { %v1843_v54 = vrot.slane %v1841_v50, 7  ;;  %v1850_v16 = vshrl.u32 %v2438_v52, 16  ;;  %v1853_v62 = vshll.u32 %v2438_v52, 16  ;;  %v2425_v51 = vld [vmem:[%s3729_s14] ss:$0 sm:$0xff]  ;;  %s2269_s14 = sshll.u32 %s3144_s13, 4  ;;  %s2270_s14 = int_to_ptr.vmem [resolvable:$true] %s2269_s14 }
 0x57a   :  { %v1771_v10 = vmax.f32 %v1766_v53, 0.0  ;;  %s3099_s0 = scalar_lea.vmem %s2270_s14, 512  ;;  %p3104_p7 = scmp.lt.s32.totalorder %s2270_s14, %s2270_s14 }
 0x57b   :  { %v1846_v59 = vor.u32 %v1844_v55, %v1843_v54  ;;  %v1852_v60 = vrot.slane %v1850_v16, 7  ;;  %v1848_v2 = vrot.slane %v1843_v54, 4  ;;  %p3100_p6 = scmp.ne.s32.totalorder %s2270_s14, %s3099_s0  ;;  %p3105_p8 = scmp.lt.s32.totalorder %s3099_s0, %s3099_s0 }
 0x57c   :  { %v1806_v63 = vmul.f32 %v1800_v56, %v1771_v10 }
 0x57d   :  { %v1847_v1 = vsel %vm3417_vm10, %v1839_v57, %v1846_v59  ;;  %v1855_v3 = vor.u32 %v1853_v62, %v1852_v60  ;;  %v1879_v5 = vld [vmem:[#allocation2] sm:$0xf]  ;;  %v1857_v61 = vrot.slane %v1852_v60, 4  ;;  %p3106_p9 = por %p3105_p8, %p3104_p7 }
 0x57e   :  { %1874 = vst.msk [vmem:[#allocation2 + $0x8] sm:$0xf] %vm519_vm7, %v1847_v1  ;;  %v2439_v4 = vpack.c.bf16 %v1806_v63, %v1806_v63  ;;  %v2117_v43 = vld [vmem:[#allocation2] sm:$0xe] }
 0x57f   :  { %v3647_v29 = vld [vmem:[#allocation2 + $0x4] sm:$0xf]  ;;  %v1856_v6 = vsel %vm3417_vm10, %v1848_v2, %v1855_v3  ;;  %p3107_p10 = pnand %p3106_p9, %p3100_p6 }
 0x580   :  { %v1859_v58 = vshrl.u32 %v2439_v4, 16  ;;  %v2398_v7 = vcombine.low %v1879_v5, %v3647_v29  ;;  %1875 = vst.msk [vmem:[#allocation2 + $0xc] sm:$0xf] %vm519_vm7, %v1856_v6  ;;  %v1862_v9 = vshll.u32 %v2439_v4, 16  ;;  %v2416_v30 = vcombine.low %v2117_v43, %v3647_v29 }
 0x582   :  { %v1861_v8 = vrot.slane %v1859_v58, 7  ;;  %v1918_v12 = vshll.u32 %v2398_v7, 16  ;;  %v1916_v20 = vshrl.u32 %v2398_v7, 16  ;;  %v2130_v45 = vrot.slane %v2416_v30, 1 }
 0x584   :  { %v1864_v11 = vor.u32 %v1862_v9, %v1861_v8  ;;  %v1920_v19 = vrot.slane %v1918_v12, 1 }
 0x586   :  { %v1865_v14 = vsel %vm3417_vm10, %v1857_v61, %v1864_v11  ;;  %v1921_v23 = vor.u32 %v1920_v19, %v1916_v20 }
 0x587   :  { %v1877_v17 = vsel %vm3485_vm2, %v1865_v14, %v1876_v15  ;;  %v2955_v18 = vld [vmem:[#allocation2 + $0x8] sm:$0xff]  }
 0x588   :  { %1878 = vst [vmem:[#allocation2 + $0x10] sm:$0x3] %v1877_v17  ;;  %v1923_v22 = vshll.u32 %v2955_v18, 16  ;;  %v1927_v13 = vshrl.u32 %v2955_v18, 16  ;;  %v2131_v44 = vrot.slane %v2955_v18, 1 }
 0x58a   :  { %v1925_v24 = vrot.slane %v1923_v22, 1  ;;  %v2132_v46 = vsel %vm1157_vm3, %v2130_v45, %v2131_v44 }
 0x58c   :  { %v1926_v26 = vsel %vm940_vm4, %v1921_v23, %v1925_v24  ;;  %v1929_v31 = vor.u32 %v1927_v13, %v1925_v24 }
 0x58d   :  { %2752 = vmatmul.mubr.msk.bf16.vlgmr.msra.gmra.mrb[24].mxu0 %vm988_vm11, %v1926_v26 }
 0x58e   :  { %2764 = vmatpush3.bf16.msra.mxu0 %v2956_v25  ;;  %2755 = vmatprep.mubr.msk.bf16.mxu0 %vm3142_vm0, %v3141_v0 }
 0x58f   :  { %v2957_v27 = vld [vmem:[#allocation2 + $0x10] ss:$0 sps:$4 sm:$0x33]   ;;  %2765 = vmatprep.subr.bf16.mxu0 %v3141_v0 }
 0x590   :  { %v1931_v28 = vshll.u32 %v2957_v27, 16  ;;  %v1935_v32 = vshrl.u32 %v2957_v27, 16  ;;  %v2963_v42 = vld [vmem:[#allocation2 + $0x10] ss:$0 sps:$4 sm:$0x11]   ;;  %v2133_v47 = vrot.slane %v2957_v27, 1 }
 0x592   :  { %v1933_v34 = vrot.slane %v1931_v28, 1  ;;  %2766 = vmatpush3.bf16.msra.mxu0 %v2958_v21  ;;  %v2134_v48 = vsel %vm1157_vm3, %v2131_v44, %v2133_v47 }
 0x593   :  { %2767 = vmatprep.subr.bf16.mxu0 %v3141_v0 }
 0x594   :  { %v1934_v33 = vsel %vm940_vm4, %v1929_v31, %v1933_v34  ;;  %v1937_v37 = vor.u32 %v1935_v32, %v1933_v34 }
 0x595   :  { %2756 = vmatmul.mubr.msk.bf16.gmra.mrb[28].mxu0 %vm988_vm11, %v1934_v33 }
 0x596   :  { %2759 = vmatprep.mubr.msk.bf16.mxu0 %vm3142_vm0, %v3141_v0  ;;  %2768 = vmatpush3.bf16.msra.mxu0 %v2959_v35 }
 0x597   :  { %2769 = vmatprep.subr.bf16.mxu0 %v3141_v0 }
 0x59a   :  { %2770 = vmatpush3.bf16.msra.mxu0 %v2960_v36 }
 0x59b   :  { %2783 = vmatprep.subr.bf16.mxu0 %v3141_v0 }
 0x59d   :  { %2760 = vmatmul.mubr.msk.bf16.gmra.mrb[32].mxu0 %vm988_vm11, %v1937_v37 }
 0x59e   :  { %2771 = vmatprep.mubr.msk.bf16.mxu0 %vm3142_vm0, %v3141_v0 }
 0x5a5   :  { %2772 = vmatmul.mubr.msk.bf16.vlgmr.msra.gmra.mrb[24].mxu0 %vm988_vm11, %v2398_v7 }
 0x5a6   :  { %2784 = vmatpush3.bf16.msra.mxu0 %v2961_v38  ;;  %2775 = vmatprep.mubr.msk.bf16.mxu0 %vm3142_vm0, %v3141_v0 }
 0x5a7   :  { %2785 = vmatprep.subr.bf16.mxu0 %v3141_v0 }
 0x5aa   :  { %2786 = vmatpush3.bf16.msra.mxu0 %v2962_v39 }
 0x5ab   :  { %2787 = vmatprep.subr.bf16.mxu0 %v3141_v0 }
 0x5ad   :  { %2776 = vmatmul.mubr.msk.bf16.gmra.mrb[28].mxu0 %vm988_vm11, %v2955_v18 }
 0x5ae   :  { %2779 = vmatprep.mubr.msk.bf16.mxu0 %vm3142_vm0, %v3141_v0  ;;  %2788 = vmatpush3.bf16.msra.mxu0 %v2964_v40 }
 0x5af   :  { %2789 = vmatprep.subr.bf16.mxu0 %v3141_v0 }
 0x5b2   :  { %2790 = vmatpush3.bf16.msra.mxu0 %v2965_v41 }
 0x5b5   :  { %2780 = vmatmul.mubr.msk.bf16.gmra.mrb[32].mxu0 %vm988_vm11, %v2963_v42 }
 0x5b6   :  { %2791 = vmatprep.mubr.msk.bf16.mxu0 %vm3142_vm0, %v3141_v0 }
 0x5bd   :  { %2792 = vmatmul.mubr.msk.bf16.vlgmr.msra.gmra.mrb[24].mxu0 %vm988_vm11, %v2132_v46 }
 0x5be   :  { %2795 = vmatprep.mubr.msk.bf16.mxu0 %vm3142_vm0, %v3141_v0 }
 0x5c5   :  { %2796 = vmatmul.mubr.msk.bf16.gmra.mrb[28].mxu0 %vm988_vm11, %v2134_v48 }
 0x5c6   :  { %2799 = vmatprep.mubr.msk.bf16.mxu0 %vm3142_vm0, %v3141_v0 }
 0x5cd   :  { %2800 = vmatmul.mubr.msk.bf16.gmra.mrb[32].mxu0 %vm988_vm11, %v2133_v47 }
 0x690   :  { %v2202_v50 = vpop.f32.mrb[24].mxu0 }
 0x691   :  { %v2236_v52 = vmul.f32 %v2424_v49, %v2202_v50  ;;  %v2793_v53 = vpop.f32.mrb[25].mxu0 }
 0x692   :  { %v2205_v54 = vpop.f32.mrb[26].mxu0 }
 0x693   :  { %v2248_v55 = vadd.f32 %v2425_v51, %v2236_v52  ;;  %v2237_v16 = vmul.f32 %v2424_v49, %v2205_v54  ;;  %v2794_v10 = vpop.f32.mrb[27].mxu0 }
 0x695   :  { %v2253_v56 = vmax.f32 %v2248_v55, 0.0  ;;  %v2249_v57 = vadd.f32 %v2425_v51, %v2237_v16 }
 0x697   :  { %2258 = vst [vmem:[#allocation14] sm:$0xff] %v2253_v56  ;;  %v2254_v0 = vmax.f32 %v2249_v57, 0.0 }
 0x698   :  { %v2210_v59 = vpop.f32.mrb[28].mxu0 }
 0x699   :  { %2259 = vst [vmem:[#allocation14 + $0x8] sm:$0xff] %v2254_v0  ;;  %v2238_v60 = vmul.f32 %v2424_v49, %v2210_v59  ;;  %v2797_v62 = vpop.f32.mrb[29].mxu0 }
 0x69a   :  { %v2213_v63 = vpop.f32.mrb[30].mxu0 }
 0x69b   :  { %v2250_v1 = vadd.f32 %v2425_v51, %v2238_v60  ;;  %v2239_v2 = vmul.f32 %v2424_v49, %v2213_v63  ;;  %v2798_v3 = vpop.f32.mrb[31].mxu0 }
 0x69d   :  { %v2255_v4 = vmax.f32 %v2250_v1, 0.0  ;;  %v2251_v5 = vadd.f32 %v2425_v51, %v2239_v2 }
 0x69f   :  { %2261 = vst [vmem:[#allocation14 + $0xe] sm:$0xfc] %v2255_v4  ;;  %v2256_v29 = vmax.f32 %v2251_v5, 0.0 }
 0x6a0   :  { %v2218_v6 = vpop.f32.mrb[32].mxu0 }
 0x6a1   :  { %2262 = vst [vmem:[#allocation14 + $0x16] sm:$0xff] %v2256_v29  ;;  %v2240_v58 = vmul.f32 %v2424_v49, %v2218_v6  ;;  %v2801_v7 = vpop.f32.mrb[33].mxu0 }
 0x6a2   :  { %v2221_v8 = vpop.f32.mrb[34].mxu0 }
 0x6a3   :  { %v2252_v9 = vadd.f32 %v2425_v51, %v2240_v58  ;;  %v2802_v61 = vpop.f32.mrb[35].mxu0 }
 0x6a5   :  { %v2257_v11 = vmax.f32 %v2252_v9, 0.0 }
 0x6a7   :  { %2263 = vst [vmem:[#allocation14 + $0x1e] sm:$0x3] %v2257_v11 }
 0x6a8   :  { %3110 = shalt.err (!%p3107_p10)
}
 0x6a9   :  { %s3111_s8 = scalar_lea.hbm %s3730_s15, 512 }
 0x6aa   :  { %p3112_p11 = scmp.ne.s32.totalorder %s3730_s15, %s3111_s8  ;;  %p3115_p12 = scmp.lt.u32.totalorder %s3111_s8, %s3730_s15 }
 0x6ac   :  { %p3117_p13 = pnand %p3115_p12, %p3112_p11 }
 0x6ae   :  { %3120 = shalt.err (!%p3117_p13)
}
 0x6af   :  { %2275 = dma.vmem_to_hbm [thread:$0]  %s2270_s14, 512, %s3730_s15, [#allocation5], %s3736_s29, %s3736_s29, %s3735_s21  }
 0x6b0   :  { %3129 = dma.done.wait [#allocation5], 512  }
 0x6b1   :  { %3130 = vsyncadd [#allocation5], 4294966784 }
 0x6b2   :  { %2279 = vsyncpa [#allocation4], 1 }
 0x6b3   :  { %2280 = vsyncpa [#allocation7], 1 }
 0x6b4   :  { %2281 = vsyncpa [#allocation10], 1 }
 0x6b5   :  { %2282 = vsyncpa [#allocation13], 1 }
 0x6b6   :  { %2283 = vsyncpa [#allocation5], 1 }

</bundles_post_ra>
